<compile_context>
chip_gen: v7x
topology: tpu7x:2x2x1
jax: 0.10.0
libtpu: 0.0.40
codegen_flags: <defaults>
</compile_context>

<pallas_src>
import numpy as np
import jax
import jax.numpy as jnp
from jax.experimental import pallas as pl
from jax.experimental.pallas import tpu as pltpu


# ---------------------------------------------------------------------------
# Host-side helpers
# ---------------------------------------------------------------------------
def nchw_to_kspace(x):
    """(N, 2C, H, W) -> (N, C, H, W, 2)  (pure reshape/permute, same as PyTorch)."""
    n, c2, h, w = x.shape
    assert c2 % 2 == 0
    return x.reshape(n, c2 // 2, 2, h, w).transpose(0, 1, 3, 4, 2)


def _shifted_dft_mats(n, n_pad, inverse, transpose):
    """(re, im) of M s.t. M @ x == fftshift((i)fft(ifftshift(x), norm='ortho')) along
    a length-n axis, zero-padded to (n_pad, n_pad), cast to bf16 (MXU operands)."""
    eye = np.eye(n, dtype=np.complex128)
    m = np.fft.fftshift(
        (np.fft.ifft if inverse else np.fft.fft)(
            np.fft.ifftshift(eye, axes=0), axis=0, norm='ortho'), axes=0)
    if transpose:
        m = m.T

    def pad_cast(a):
        out = np.zeros((n_pad, n_pad), np.float32)
        out[:n, :n] = a.astype(np.float32)
        return jnp.asarray(out).astype(jnp.bfloat16)

    return pad_cast(np.real(m)), pad_cast(np.imag(m))


def _param_plane(p, H, W, name):
    """Collapse a weighting/mask map to one (H, W) f32 plane.  The map must be
    batch-, coil- and complex-channel invariant (the standard fastMRI case)."""
    p = jnp.asarray(p, jnp.float32)
    if p.ndim > 5:
        raise ValueError(f'{name}: rank {p.ndim} > 5 is not supported.')
    shp = (1,) * (5 - p.ndim) + tuple(p.shape)
    if shp[0] != 1 or shp[1] != 1 or shp[4] != 1:
        raise NotImplementedError(
            f'{name} must be batch-, coil- and complex-channel invariant, got {p.shape}.')
    return jnp.broadcast_to(p.reshape(shp), (1, 1, H, W, 1))[0, 0, :, :, 0]


def _vmem_cap_bytes():
    try:
        cap = getattr(pltpu.get_tpu_info(), 'vmem_capacity_bytes', None)
        if cap:
            return int(cap)
    except Exception:
        pass
    return 64 * 1024 * 1024   # conservative fallback (v7x per-TensorCore VMEM)


def _vmem_estimate(Hp, Wp, Ht):
    """Per-grid-step VMEM footprint (bytes) of the pallas_call below."""
    f32, bf16 = 4, 2
    resident_in = (2 * (2 * Hp * Wp * f32)     # rec, tgt coil blocks
                   + 2 * (Hp * Wp * f32)       # a, b maps
                   + 2 * (Hp * Hp * bf16)      # l_re, l_im
                   + 2 * (Wp * Wp * bf16))     # rt_re, rt_im (fully resident)
    blocked_out = (3 * 2 + 1) * Ht * Wp * f32  # sk/ks/cm (2 planes each) + img
    scratch = 2 * Hp * Wp * (f32 + bf16)       # x32 + x16 coil scratch
    # ~8 (Ht, Wp) f32 temporaries live in the matmul/store path plus ~4 full-plane
    # temporaries inside the row-block-0 branch, plus internal scratch slack.
    temps = 8 * Ht * Wp * f32 + 4 * Hp * Wp * f32
    return 2 * (resident_in + blocked_out) + scratch + temps + (2 << 20)


def _choose_h_tile(Hp, Wp, cap):
    """Largest row tile (dividing Hp, multiple of 16) whose footprint fits ~75% of VMEM."""
    cands = [Hp] + [h for h in (512, 256, 128, 64, 32, 16) if h < Hp and Hp % h == 0]
    for ht in cands:
        if _vmem_estimate(Hp, Wp, ht) <= 0.75 * cap:
            return ht
    # TODO(synk): also tile the W axis / the x scratch if even Ht=16 does not fit;
    #             not needed for typical fastMRI extents on 64 MiB VMEM.
    return cands[-1]


# ---------------------------------------------------------------------------
# Pallas kernel
# ---------------------------------------------------------------------------
def _make_kernel(kspace_is_left, Ht):
    """kspace_is_left=True  -> kspace = L @ x (height DFT), cmg = x @ R^T (width IDFT)
       kspace_is_left=False -> kspace = x @ R^T (width DFT), cmg = L @ x (height IDFT)"""
    f32 = jnp.float32

    def kernel(rec_ref, tgt_ref, a_ref, b_ref,
               l_re_ref, l_im_ref, rt_re_ref, rt_im_ref,
               sk_ref, ks_ref, cm_ref, img_ref,
               x32_ref, x16_ref):
        i = pl.program_id(1)

        # x = rec * a + tgt * b is coil-wide; compute it once per coil (first row
        # block) into VMEM scratch: exact f32 copy (semi-kspace output) and bf16
        # copy (MXU operands of both DFTs).
        @pl.when(i == 0)
        def _():
            a = a_ref[...]
            b = b_ref[...]
            x_re = rec_ref[0] * a + tgt_ref[0] * b
            x32_ref[0] = x_re
            x16_ref[0] = x_re.astype(jnp.bfloat16)
            x_im = rec_ref[1] * a + tgt_ref[1] * b
            x32_ref[1] = x_im
            x16_ref[1] = x_im.astype(jnp.bfloat16)

        rows = pl.ds(pl.multiple_of(i * Ht, Ht), Ht)

        # semi_kspace_recons for this row block (exact f32 path).
        sk_ref[0, 0] = x32_ref[0, rows, :]
        sk_ref[0, 1] = x32_ref[1, rows, :]

        # Height transform (left-multiply): rows_i of L times the full x.
        # Plain 4-mult complex matmul (bf16 operands, f32 accumulation); stored
        # before the width-transform dots so its temporaries die early.
        lr = l_re_ref[rows, :]
        li = l_im_ref[rows, :]
        xr = x16_ref[0]
        xi = x16_ref[1]
        lh_re = (jnp.dot(lr, xr, preferred_element_type=f32)
                 - jnp.dot(li, xi, preferred_element_type=f32))
        lh_im = (jnp.dot(lr, xi, preferred_element_type=f32)
                 + jnp.dot(li, xr, preferred_element_type=f32))
        lh_out = ks_ref if kspace_is_left else cm_ref
        lh_out[0, 0] = lh_re
        lh_out[0, 1] = lh_im
        if not kspace_is_left:
            img_ref[0] = jnp.sqrt(lh_re * lh_re + lh_im * lh_im)

        # Width transform (right-multiply): rows_i of x times the full R^T.
        xr_b = x16_ref[0, rows, :]
        xi_b = x16_ref[1, rows, :]
        rtr = rt_re_ref[...]
        rti = rt_im_ref[...]
        rh_re = (jnp.dot(xr_b, rtr, preferred_element_type=f32)
                 - jnp.dot(xi_b, rti, preferred_element_type=f32))
        rh_im = (jnp.dot(xr_b, rti, preferred_element_type=f32)
                 + jnp.dot(xi_b, rtr, preferred_element_type=f32))
        rh_out = cm_ref if kspace_is_left else ks_ref
        rh_out[0, 0] = rh_re
        rh_out[0, 1] = rh_im
        if kspace_is_left:
            img_ref[0] = jnp.sqrt(rh_re * rh_re + rh_im * rh_im)

    return kernel


# ---------------------------------------------------------------------------
# Module-equivalent wrapper
# ---------------------------------------------------------------------------
def weighted_replace_post_process_semi_k(semi_kspace_outputs, targets, extra_params,
                                         weighted=True, replace=True, direction='height'):
    if direction not in ('height', 'width'):
        raise ValueError('`direction` should either be `height` or `width')
    if semi_kspace_outputs.shape[0] > 1:
        raise NotImplementedError('Only one batch at a time for now.')

    semi_kspace_targets = targets['semi_kspace_targets']
    n_t, coils, H, W, _ = semi_kspace_targets.shape
    n_o, c2, h_o, w_o = semi_kspace_outputs.shape
    left = (w_o - W) // 2
    # nchw_to_kspace(outputs[..., left:left+W]) has shape (n_o, c2//2, h_o, W, 2).
    assert (n_o, c2 // 2, h_o, W, 2) == tuple(semi_kspace_targets.shape), \
        'Reconstruction and target sizes are different.'
    assert H % 2 == 0 and W % 2 == 0, \
        'Not impossible but not expected to have sides with odd lengths.'

    # Sublane/lane-friendly padded extents.
    Hp = H + (-H) % 16
    Wp = W + (-W) % 128

    # Interleaved (re, im) coil planes (2*coils, Hp, Wp).  The recon is read
    # straight off the NCHW layer output (channel 2c = re of coil c, 2c+1 = im),
    # so the only wrapper-side HBM passes are one fused crop+pad (recon) and one
    # fused transpose+pad (targets).
    rec = jnp.pad(semi_kspace_outputs[0, :, :, left:left + W].astype(jnp.float32),
                  ((0, 0), (0, Hp - H), (0, Wp - W)))
    tgt = jnp.pad(jnp.moveaxis(semi_kspace_targets[0].astype(jnp.float32),
                               -1, 1).reshape(2 * coils, H, W),
                  ((0, 0), (0, Hp - H), (0, Wp - W)))

    # Coil-invariant (Hp, Wp) maps; the weighting divide is hoisted here so the
    # kernel computes x = rec * a + tgt * b (exact when weighted/replace are off).
    if weighted:
        inv_w = 1.0 / _param_plane(extra_params['weightings'], H, W, 'weightings')
    else:
        inv_w = jnp.ones((H, W), jnp.float32)
    if replace:
        msk = _param_plane(extra_params['masks'], H, W, 'masks')
    else:
        msk = jnp.zeros((H, W), jnp.float32)
    a = jnp.pad(inv_w * (1.0 - msk), ((0, Hp - H), (0, Wp - W)))
    b = jnp.pad(msk, ((0, Hp - H), (0, Wp - W)))

    # L acts along height (left-multiply), R^T along width (right-multiply).
    # fft1 along `direction`, ifft1 along the opposite (recon) direction.
    l_re, l_im = _shifted_dft_mats(H, Hp, inverse=(direction == 'width'), transpose=False)
    rt_re, rt_im = _shifted_dft_mats(W, Wp, inverse=(direction == 'height'), transpose=True)

    cap = _vmem_cap_bytes()
    Ht = _choose_h_tile(Hp, Wp, cap)
    n_hblk = Hp // Ht
    est = _vmem_estimate(Hp, Wp, Ht)
    vmem_limit = int(min(max(1.25 * est, 32 << 20), 0.9 * cap))

    kernel = _make_kernel(kspace_is_left=(direction == 'height'), Ht=Ht)

    coil_in_spec = pl.BlockSpec((2, Hp, Wp), lambda c, i: (c, 0, 0))      # rec / tgt
    const_hw = pl.BlockSpec((Hp, Wp), lambda c, i: (0, 0))                # a / b
    const_hh = pl.BlockSpec((Hp, Hp), lambda c, i: (0, 0))                # L re/im
    const_ww = pl.BlockSpec((Wp, Wp), lambda c, i: (0, 0))                # R^T re/im
    cplx_out_spec = pl.BlockSpec((1, 2, Ht, Wp), lambda c, i: (c, 0, i, 0))
    img_out_spec = pl.BlockSpec((1, Ht, Wp), lambda c, i: (c, i, 0))

    out_shape = (jax.ShapeDtypeStruct((coils, 2, Hp, Wp), jnp.float32),) * 3 + \
                (jax.ShapeDtypeStruct((coils, Hp, Wp), jnp.float32),)

    sk, ks, cm, img = pl.pallas_call(
        kernel,
        out_shape=out_shape,
        grid_spec=pltpu.PrefetchScalarGridSpec(
            num_scalar_prefetch=0,
            grid=(coils, n_hblk),
            in_specs=[coil_in_spec, coil_in_spec, const_hw, const_hw,
                      const_hh, const_hh, const_ww, const_ww],
            out_specs=[cplx_out_spec, cplx_out_spec, cplx_out_spec, img_out_spec],
            scratch_shapes=[pltpu.VMEM((2, Hp, Wp), jnp.float32),
                            pltpu.VMEM((2, Hp, Wp), jnp.bfloat16)],
        ),
        compiler_params=pltpu.CompilerParams(
            dimension_semantics=("parallel", "arbitrary"),
            vmem_limit_bytes=vmem_limit,
        ),
    )(rec, tgt, a, b, l_re, l_im, rt_re, rt_im)

    def to_nchw2(x):   # (coils, 2, Hp, Wp) -> (1, coils, H, W, 2)
        return jnp.moveaxis(x[:, :, :H, :W], 1, -1)[None]

    return {
        'semi_kspace_recons': to_nchw2(sk),
        'kspace_recons': to_nchw2(ks),
        'cmg_recons': to_nchw2(cm),
        'img_recons': img[:, :H, :W][None],
    }


# ---------------------------------------------------------------------------
# Pure-JAX reference (for validation only)
# ---------------------------------------------------------------------------
def _reference_forward(semi_kspace_outputs, targets, extra_params, direction='height'):
    tgt = targets['semi_kspace_targets']
    left = (semi_kspace_outputs.shape[-1] - tgt.shape[-2]) // 2
    right = left + tgt.shape[-2]
    rec = nchw_to_kspace(semi_kspace_outputs[..., left:right])
    x = rec[..., 0] + 1j * rec[..., 1]
    t = tgt[..., 0] + 1j * tgt[..., 1]
    wgt = extra_params['weightings'][..., 0]
    msk = extra_params['masks'][..., 0]
    x = x / wgt
    x = x * (1 - msk) + t * msk

    def f1(data, axis, inverse):
        data = jnp.fft.ifftshift(data, axes=axis)
        data = (jnp.fft.ifft if inverse else jnp.fft.fft)(data, axis=axis, norm='ortho')
        return jnp.fft.fftshift(data, axes=axis)

    if direction == 'height':
        ks = f1(x, -2, inverse=False)
        cmg = f1(x, -1, inverse=True)
    else:
        ks = f1(x, -1, inverse=False)
        cmg = f1(x, -2, inverse=True)
    img = jnp.abs(cmg)
    to5 = lambda z: jnp.stack([jnp.real(z), jnp.imag(z)], axis=-1)
    return {'semi_kspace_recons': to5(x), 'kspace_recons': to5(ks),
            'cmg_recons': to5(cmg), 'img_recons': img}


# ---------------------------------------------------------------------------
if __name__ == "__main__":
    key = jax.random.PRNGKey(0)
    k1, k2, k3, k4 = jax.random.split(key, 4)

    N, coils, H, W, W_pad = 1, 4, 16, 16, 24
    semi_kspace_outputs = jax.random.normal(k1, (N, 2 * coils, H, W_pad), jnp.float32)
    semi_kspace_targets = jax.random.normal(k2, (N, coils, H, W, 2), jnp.float32)
    weightings = jax.random.uniform(k3, (1, 1, H, W, 1), jnp.float32, 0.5, 1.5)
    masks = (jax.random.uniform(k4, (1, 1, 1, W, 1)) < 0.4).astype(jnp.float32)

    targets = {'semi_kspace_targets': semi_kspace_targets}
    extra_params = {'weightings': weightings, 'masks': masks}

    # semi_kspace path is pure f32 elementwise (tight); DFT outputs use bf16 MXU
    # operands with f32 accumulation (looser bound).
    tols = {
        'semi_kspace_recons': (1e-3, 1e-3),
        'kspace_recons': (2e-2, 3e-2),
        'cmg_recons': (2e-2, 3e-2),
        'img_recons': (2e-2, 3e-2),
    }

    for direction in ('height', 'width'):
        recons = weighted_replace_post_process_semi_k(
            semi_kspace_outputs, targets, extra_params,
            weighted=True, replace=True, direction=direction)
        recons = jax.block_until_ready(recons)
        ref = _reference_forward(semi_kspace_outputs, targets, extra_params,
                                 direction=direction)
        for name, (rtol, atol) in tols.items():
            got, want = recons[name], ref[name]
            assert got.shape == want.shape, (direction, name, got.shape, want.shape)
            assert jnp.allclose(got, want, rtol=rtol, atol=atol), \
                f"{direction}/{name} mismatch, max err {jnp.max(jnp.abs(got - want))}"

    print("KERNEL_OK")
</pallas_src>

<mosaic_0001>
module attributes {stable_mosaic.version = 11 : i64} {
  func.func @kernel(%arg0: i32, %arg1: i32, %arg2: memref<2x16x128xf32, #tpu.memory_space<vmem>>, %arg3: memref<2x16x128xf32, #tpu.memory_space<vmem>>, %arg4: memref<16x128xf32, #tpu.memory_space<vmem>>, %arg5: memref<16x128xf32, #tpu.memory_space<vmem>>, %arg6: memref<16x16xbf16, #tpu.memory_space<vmem>>, %arg7: memref<16x16xbf16, #tpu.memory_space<vmem>>, %arg8: memref<128x128xbf16, #tpu.memory_space<vmem>>, %arg9: memref<128x128xbf16, #tpu.memory_space<vmem>>, %arg10: memref<1x2x16x128xf32, #tpu.memory_space<vmem>>, %arg11: memref<1x2x16x128xf32, #tpu.memory_space<vmem>>, %arg12: memref<1x2x16x128xf32, #tpu.memory_space<vmem>>, %arg13: memref<1x16x128xf32, #tpu.memory_space<vmem>>, %arg14: memref<2x16x128xf32, #tpu.memory_space<vmem>>, %arg15: memref<2x16x128xbf16, #tpu.memory_space<vmem>>) attributes {dimension_semantics = [#tpu.dimension_semantics<parallel>, #tpu.dimension_semantics<arbitrary>], iteration_bounds = array<i64: 4, 1>, scalar_prefetch = 0 : i64, scratch_operands = 2 : i64, tpu.core_type = #tpu.core_type<tc>, window_params = [{transform_indices = @transform_0, window_bounds = array<i64: 2, 16, 128>}, {transform_indices = @transform_1, window_bounds = array<i64: 2, 16, 128>}, {pipeline_mode = #tpu.pipeline_mode<synchronous>, transform_indices = @transform_2, window_bounds = array<i64: 16, 128>}, {pipeline_mode = #tpu.pipeline_mode<synchronous>, transform_indices = @transform_3, window_bounds = array<i64: 16, 128>}, {pipeline_mode = #tpu.pipeline_mode<synchronous>, transform_indices = @transform_4, window_bounds = array<i64: 16, 16>}, {pipeline_mode = #tpu.pipeline_mode<synchronous>, transform_indices = @transform_5, window_bounds = array<i64: 16, 16>}, {pipeline_mode = #tpu.pipeline_mode<synchronous>, transform_indices = @transform_6, window_bounds = array<i64: 128, 128>}, {pipeline_mode = #tpu.pipeline_mode<synchronous>, transform_indices = @transform_7, window_bounds = array<i64: 128, 128>}, {transform_indices = @transform_8, window_bounds = array<i64: 1, 2, 16, 128>}, {transform_indices = @transform_9, window_bounds = array<i64: 1, 2, 16, 128>}, {transform_indices = @transform_10, window_bounds = array<i64: 1, 2, 16, 128>}, {transform_indices = @transform_11, window_bounds = array<i64: 1, 16, 128>}]} {
    %c0_i32 = arith.constant 0 : i32
    %0 = arith.cmpi eq, %arg1, %c0_i32 : i32
    %1 = arith.extui %0 : i1 to i32
    %c0_i32_0 = arith.constant 0 : i32
    %2 = arith.cmpi ne, %1, %c0_i32_0 : i32
    scf.if %2 {
      %c0_53 = arith.constant 0 : index
      %c0_54 = arith.constant 0 : index
      %64 = vector.load %arg4[%c0_53, %c0_54] : memref<16x128xf32, #tpu.memory_space<vmem>>, vector<16x128xf32>
      %c0_55 = arith.constant 0 : index
      %c0_56 = arith.constant 0 : index
      %65 = vector.load %arg5[%c0_55, %c0_56] : memref<16x128xf32, #tpu.memory_space<vmem>>, vector<16x128xf32>
      %c0_57 = arith.constant 0 : index
      %c0_58 = arith.constant 0 : index
      %c0_59 = arith.constant 0 : index
      %66 = vector.load %arg2[%c0_57, %c0_58, %c0_59] : memref<2x16x128xf32, #tpu.memory_space<vmem>>, vector<1x16x128xf32>
      %67 = vector.shape_cast %66 : vector<1x16x128xf32> to vector<16x128xf32>
      %68 = arith.mulf %67, %64 : vector<16x128xf32>
      %c0_60 = arith.constant 0 : index
      %c0_61 = arith.constant 0 : index
      %c0_62 = arith.constant 0 : index
      %69 = vector.load %arg3[%c0_60, %c0_61, %c0_62] : memref<2x16x128xf32, #tpu.memory_space<vmem>>, vector<1x16x128xf32>
      %70 = vector.shape_cast %69 : vector<1x16x128xf32> to vector<16x128xf32>
      %71 = arith.mulf %70, %65 : vector<16x128xf32>
      %72 = arith.addf %68, %71 : vector<16x128xf32>
      %c0_63 = arith.constant 0 : index
      %c0_64 = arith.constant 0 : index
      %c0_65 = arith.constant 0 : index
      %73 = vector.load %arg14[%c0_63, %c0_64, %c0_65] : memref<2x16x128xf32, #tpu.memory_space<vmem>>, vector<1x16x128xf32>
      %74 = vector.shape_cast %73 : vector<1x16x128xf32> to vector<16x128xf32>
      %75 = vector.shape_cast %72 : vector<16x128xf32> to vector<1x16x128xf32>
      tpu.vector_store %arg14[%c0_63, %c0_64, %c0_65], %75 {strides = array<i32>} : memref<2x16x128xf32, #tpu.memory_space<vmem>>, vector<1x16x128xf32>,
      %76 = arith.truncf %72 : vector<16x128xf32> to vector<16x128xbf16>
      %c0_66 = arith.constant 0 : index
      %c0_67 = arith.constant 0 : index
      %c0_68 = arith.constant 0 : index
      %77 = vector.load %arg15[%c0_66, %c0_67, %c0_68] : memref<2x16x128xbf16, #tpu.memory_space<vmem>>, vector<1x16x128xbf16>
      %78 = vector.shape_cast %77 : vector<1x16x128xbf16> to vector<16x128xbf16>
      %79 = vector.shape_cast %76 : vector<16x128xbf16> to vector<1x16x128xbf16>
      tpu.vector_store %arg15[%c0_66, %c0_67, %c0_68], %79 {strides = array<i32>} : memref<2x16x128xbf16, #tpu.memory_space<vmem>>, vector<1x16x128xbf16>,
      %c1_69 = arith.constant 1 : index
      %c0_70 = arith.constant 0 : index
      %c0_71 = arith.constant 0 : index
      %80 = vector.load %arg2[%c1_69, %c0_70, %c0_71] : memref<2x16x128xf32, #tpu.memory_space<vmem>>, vector<1x16x128xf32>
      %81 = vector.shape_cast %80 : vector<1x16x128xf32> to vector<16x128xf32>
      %82 = arith.mulf %81, %64 : vector<16x128xf32>
      %c1_72 = arith.constant 1 : index
      %c0_73 = arith.constant 0 : index
      %c0_74 = arith.constant 0 : index
      %83 = vector.load %arg3[%c1_72, %c0_73, %c0_74] : memref<2x16x128xf32, #tpu.memory_space<vmem>>, vector<1x16x128xf32>
      %84 = vector.shape_cast %83 : vector<1x16x128xf32> to vector<16x128xf32>
      %85 = arith.mulf %84, %65 : vector<16x128xf32>
      %86 = arith.addf %82, %85 : vector<16x128xf32>
      %c1_75 = arith.constant 1 : index
      %c0_76 = arith.constant 0 : index
      %c0_77 = arith.constant 0 : index
      %87 = vector.load %arg14[%c1_75, %c0_76, %c0_77] : memref<2x16x128xf32, #tpu.memory_space<vmem>>, vector<1x16x128xf32>
      %88 = vector.shape_cast %87 : vector<1x16x128xf32> to vector<16x128xf32>
      %89 = vector.shape_cast %86 : vector<16x128xf32> to vector<1x16x128xf32>
      tpu.vector_store %arg14[%c1_75, %c0_76, %c0_77], %89 {strides = array<i32>} : memref<2x16x128xf32, #tpu.memory_space<vmem>>, vector<1x16x128xf32>,
      %90 = arith.truncf %86 : vector<16x128xf32> to vector<16x128xbf16>
      %c1_78 = arith.constant 1 : index
      %c0_79 = arith.constant 0 : index
      %c0_80 = arith.constant 0 : index
      %91 = vector.load %arg15[%c1_78, %c0_79, %c0_80] : memref<2x16x128xbf16, #tpu.memory_space<vmem>>, vector<1x16x128xbf16>
      %92 = vector.shape_cast %91 : vector<1x16x128xbf16> to vector<16x128xbf16>
      %93 = vector.shape_cast %90 : vector<16x128xbf16> to vector<1x16x128xbf16>
      tpu.vector_store %arg15[%c1_78, %c0_79, %c0_80], %93 {strides = array<i32>} : memref<2x16x128xbf16, #tpu.memory_space<vmem>>, vector<1x16x128xbf16>,
    } else {
    }
    %c16_i32 = arith.constant 16 : i32
    %3 = arith.muli %arg1, %c16_i32 : i32
    %4 = tpu.assume_multiple %3, 16 : i32
    %c0 = arith.constant 0 : index
    %5 = arith.index_cast %4 : i32 to index
    %c0_1 = arith.constant 0 : index
    %6 = vector.load %arg14[%c0, %5, %c0_1] : memref<2x16x128xf32, #tpu.memory_space<vmem>>, vector<1x16x128xf32>
    %7 = vector.shape_cast %6 : vector<1x16x128xf32> to vector<16x128xf32>
    %c0_2 = arith.constant 0 : index
    %c0_3 = arith.constant 0 : index
    %c0_4 = arith.constant 0 : index
    %c0_5 = arith.constant 0 : index
    %8 = vector.load %arg10[%c0_2, %c0_3, %c0_4, %c0_5] : memref<1x2x16x128xf32, #tpu.memory_space<vmem>>, vector<1x1x16x128xf32>
    %9 = vector.shape_cast %8 : vector<1x1x16x128xf32> to vector<16x128xf32>
    %10 = vector.shape_cast %7 : vector<16x128xf32> to vector<1x1x16x128xf32>
    tpu.vector_store %arg10[%c0_2, %c0_3, %c0_4, %c0_5], %10 {strides = array<i32>} : memref<1x2x16x128xf32, #tpu.memory_space<vmem>>, vector<1x1x16x128xf32>,
    %c1 = arith.constant 1 : index
    %11 = arith.index_cast %4 : i32 to index
    %c0_6 = arith.constant 0 : index
    %12 = vector.load %arg14[%c1, %11, %c0_6] : memref<2x16x128xf32, #tpu.memory_space<vmem>>, vector<1x16x128xf32>
    %13 = vector.shape_cast %12 : vector<1x16x128xf32> to vector<16x128xf32>
    %c0_7 = arith.constant 0 : index
    %c1_8 = arith.constant 1 : index
    %c0_9 = arith.constant 0 : index
    %c0_10 = arith.constant 0 : index
    %14 = vector.load %arg10[%c0_7, %c1_8, %c0_9, %c0_10] : memref<1x2x16x128xf32, #tpu.memory_space<vmem>>, vector<1x1x16x128xf32>
    %15 = vector.shape_cast %14 : vector<1x1x16x128xf32> to vector<16x128xf32>
    %16 = vector.shape_cast %13 : vector<16x128xf32> to vector<1x1x16x128xf32>
    tpu.vector_store %arg10[%c0_7, %c1_8, %c0_9, %c0_10], %16 {strides = array<i32>} : memref<1x2x16x128xf32, #tpu.memory_space<vmem>>, vector<1x1x16x128xf32>,
    %17 = arith.index_cast %4 : i32 to index
    %c0_11 = arith.constant 0 : index
    %18 = vector.load %arg6[%17, %c0_11] : memref<16x16xbf16, #tpu.memory_space<vmem>>, vector<16x16xbf16>
    %19 = arith.index_cast %4 : i32 to index
    %c0_12 = arith.constant 0 : index
    %20 = vector.load %arg7[%19, %c0_12] : memref<16x16xbf16, #tpu.memory_space<vmem>>, vector<16x16xbf16>
    %c0_13 = arith.constant 0 : index
    %c0_14 = arith.constant 0 : index
    %c0_15 = arith.constant 0 : index
    %21 = vector.load %arg15[%c0_13, %c0_14, %c0_15] : memref<2x16x128xbf16, #tpu.memory_space<vmem>>, vector<1x16x128xbf16>
    %22 = vector.shape_cast %21 : vector<1x16x128xbf16> to vector<16x128xbf16>
    %c1_16 = arith.constant 1 : index
    %c0_17 = arith.constant 0 : index
    %c0_18 = arith.constant 0 : index
    %23 = vector.load %arg15[%c1_16, %c0_17, %c0_18] : memref<2x16x128xbf16, #tpu.memory_space<vmem>>, vector<1x16x128xbf16>
    %24 = vector.shape_cast %23 : vector<1x16x128xbf16> to vector<16x128xbf16>
    %cst = arith.constant dense<0.000000e+00> : vector<16x128xf32>
    %25 = tpu.matmul %18, %22, %cst {dimension_numbers = #tpu.dot_dimension_numbers<[1], [0], [0], [1], [0, 0, 1, 1], [], []>} : vector<16x16xbf16>, vector<16x128xbf16>, vector<16x128xf32> -> vector<16x128xf32>
    %cst_19 = arith.constant dense<0.000000e+00> : vector<16x128xf32>
    %26 = tpu.matmul %20, %24, %cst_19 {dimension_numbers = #tpu.dot_dimension_numbers<[1], [0], [0], [1], [0, 0, 1, 1], [], []>} : vector<16x16xbf16>, vector<16x128xbf16>, vector<16x128xf32> -> vector<16x128xf32>
    %27 = arith.subf %25, %26 : vector<16x128xf32>
    %cst_20 = arith.constant dense<0.000000e+00> : vector<16x128xf32>
    %28 = tpu.matmul %18, %24, %cst_20 {dimension_numbers = #tpu.dot_dimension_numbers<[1], [0], [0], [1], [0, 0, 1, 1], [], []>} : vector<16x16xbf16>, vector<16x128xbf16>, vector<16x128xf32> -> vector<16x128xf32>
    %cst_21 = arith.constant dense<0.000000e+00> : vector<16x128xf32>
    %29 = tpu.matmul %20, %22, %cst_21 {dimension_numbers = #tpu.dot_dimension_numbers<[1], [0], [0], [1], [0, 0, 1, 1], [], []>} : vector<16x16xbf16>, vector<16x128xbf16>, vector<16x128xf32> -> vector<16x128xf32>
    %30 = arith.addf %28, %29 : vector<16x128xf32>
    %c0_22 = arith.constant 0 : index
    %c0_23 = arith.constant 0 : index
    %c0_24 = arith.constant 0 : index
    %c0_25 = arith.constant 0 : index
    %31 = vector.load %arg11[%c0_22, %c0_23, %c0_24, %c0_25] : memref<1x2x16x128xf32, #tpu.memory_space<vmem>>, vector<1x1x16x128xf32>
    %32 = vector.shape_cast %31 : vector<1x1x16x128xf32> to vector<16x128xf32>
    %33 = vector.shape_cast %27 : vector<16x128xf32> to vector<1x1x16x128xf32>
    tpu.vector_store %arg11[%c0_22, %c0_23, %c0_24, %c0_25], %33 {strides = array<i32>} : memref<1x2x16x128xf32, #tpu.memory_space<vmem>>, vector<1x1x16x128xf32>,
    %c0_26 = arith.constant 0 : index
    %c1_27 = arith.constant 1 : index
    %c0_28 = arith.constant 0 : index
    %c0_29 = arith.constant 0 : index
    %34 = vector.load %arg11[%c0_26, %c1_27, %c0_28, %c0_29] : memref<1x2x16x128xf32, #tpu.memory_space<vmem>>, vector<1x1x16x128xf32>
    %35 = vector.shape_cast %34 : vector<1x1x16x128xf32> to vector<16x128xf32>
    %36 = vector.shape_cast %30 : vector<16x128xf32> to vector<1x1x16x128xf32>
    tpu.vector_store %arg11[%c0_26, %c1_27, %c0_28, %c0_29], %36 {strides = array<i32>} : memref<1x2x16x128xf32, #tpu.memory_space<vmem>>, vector<1x1x16x128xf32>,
    %c0_30 = arith.constant 0 : index
    %37 = arith.index_cast %4 : i32 to index
    %c0_31 = arith.constant 0 : index
    %38 = vector.load %arg15[%c0_30, %37, %c0_31] : memref<2x16x128xbf16, #tpu.memory_space<vmem>>, vector<1x16x128xbf16>
    %39 = vector.shape_cast %38 : vector<1x16x128xbf16> to vector<16x128xbf16>
    %c1_32 = arith.constant 1 : index
    %40 = arith.index_cast %4 : i32 to index
    %c0_33 = arith.constant 0 : index
    %41 = vector.load %arg15[%c1_32, %40, %c0_33] : memref<2x16x128xbf16, #tpu.memory_space<vmem>>, vector<1x16x128xbf16>
    %42 = vector.shape_cast %41 : vector<1x16x128xbf16> to vector<16x128xbf16>
    %c0_34 = arith.constant 0 : index
    %c0_35 = arith.constant 0 : index
    %43 = vector.load %arg8[%c0_34, %c0_35] : memref<128x128xbf16, #tpu.memory_space<vmem>>, vector<128x128xbf16>
    %c0_36 = arith.constant 0 : index
    %c0_37 = arith.constant 0 : index
    %44 = vector.load %arg9[%c0_36, %c0_37] : memref<128x128xbf16, #tpu.memory_space<vmem>>, vector<128x128xbf16>
    %cst_38 = arith.constant dense<0.000000e+00> : vector<16x128xf32>
    %45 = tpu.matmul %39, %43, %cst_38 {dimension_numbers = #tpu.dot_dimension_numbers<[1], [0], [0], [1], [0, 0, 1, 1], [], []>} : vector<16x128xbf16>, vector<128x128xbf16>, vector<16x128xf32> -> vector<16x128xf32>
    %cst_39 = arith.constant dense<0.000000e+00> : vector<16x128xf32>
    %46 = tpu.matmul %42, %44, %cst_39 {dimension_numbers = #tpu.dot_dimension_numbers<[1], [0], [0], [1], [0, 0, 1, 1], [], []>} : vector<16x128xbf16>, vector<128x128xbf16>, vector<16x128xf32> -> vector<16x128xf32>
    %47 = arith.subf %45, %46 : vector<16x128xf32>
    %cst_40 = arith.constant dense<0.000000e+00> : vector<16x128xf32>
    %48 = tpu.matmul %39, %44, %cst_40 {dimension_numbers = #tpu.dot_dimension_numbers<[1], [0], [0], [1], [0, 0, 1, 1], [], []>} : vector<16x128xbf16>, vector<128x128xbf16>, vector<16x128xf32> -> vector<16x128xf32>
    %cst_41 = arith.constant dense<0.000000e+00> : vector<16x128xf32>
    %49 = tpu.matmul %42, %43, %cst_41 {dimension_numbers = #tpu.dot_dimension_numbers<[1], [0], [0], [1], [0, 0, 1, 1], [], []>} : vector<16x128xbf16>, vector<128x128xbf16>, vector<16x128xf32> -> vector<16x128xf32>
    %50 = arith.addf %48, %49 : vector<16x128xf32>
    %c0_42 = arith.constant 0 : index
    %c0_43 = arith.constant 0 : index
    %c0_44 = arith.constant 0 : index
    %c0_45 = arith.constant 0 : index
    %51 = vector.load %arg12[%c0_42, %c0_43, %c0_44, %c0_45] : memref<1x2x16x128xf32, #tpu.memory_space<vmem>>, vector<1x1x16x128xf32>
    %52 = vector.shape_cast %51 : vector<1x1x16x128xf32> to vector<16x128xf32>
    %53 = vector.shape_cast %47 : vector<16x128xf32> to vector<1x1x16x128xf32>
    tpu.vector_store %arg12[%c0_42, %c0_43, %c0_44, %c0_45], %53 {strides = array<i32>} : memref<1x2x16x128xf32, #tpu.memory_space<vmem>>, vector<1x1x16x128xf32>,
    %c0_46 = arith.constant 0 : index
    %c1_47 = arith.constant 1 : index
    %c0_48 = arith.constant 0 : index
    %c0_49 = arith.constant 0 : index
    %54 = vector.load %arg12[%c0_46, %c1_47, %c0_48, %c0_49] : memref<1x2x16x128xf32, #tpu.memory_space<vmem>>, vector<1x1x16x128xf32>
    %55 = vector.shape_cast %54 : vector<1x1x16x128xf32> to vector<16x128xf32>
    %56 = vector.shape_cast %50 : vector<16x128xf32> to vector<1x1x16x128xf32>
    tpu.vector_store %arg12[%c0_46, %c1_47, %c0_48, %c0_49], %56 {strides = array<i32>} : memref<1x2x16x128xf32, #tpu.memory_space<vmem>>, vector<1x1x16x128xf32>,
    %57 = arith.mulf %47, %47 : vector<16x128xf32>
    %58 = arith.mulf %50, %50 : vector<16x128xf32>
    %59 = arith.addf %57, %58 : vector<16x128xf32>
    %60 = math.sqrt %59 : vector<16x128xf32>
    %c0_50 = arith.constant 0 : index
    %c0_51 = arith.constant 0 : index
    %c0_52 = arith.constant 0 : index
    %61 = vector.load %arg13[%c0_50, %c0_51, %c0_52] : memref<1x16x128xf32, #tpu.memory_space<vmem>>, vector<1x16x128xf32>
    %62 = vector.shape_cast %61 : vector<1x16x128xf32> to vector<16x128xf32>
    %63 = vector.shape_cast %60 : vector<16x128xf32> to vector<1x16x128xf32>
    tpu.vector_store %arg13[%c0_50, %c0_51, %c0_52], %63 {strides = array<i32>} : memref<1x16x128xf32, #tpu.memory_space<vmem>>, vector<1x16x128xf32>,
    return
  }
  func.func @transform_0(%arg0: i32, %arg1: i32) -> (i32, i32, i32) {
    %c0_i32 = arith.constant 0 : i32
    %c0_i32_0 = arith.constant 0 : i32
    %c0_i32_1 = arith.constant 0 : i32
    return %arg0, %c0_i32, %c0_i32_0 : i32, i32, i32
  }
  func.func @transform_1(%arg0: i32, %arg1: i32) -> (i32, i32, i32) {
    %c0_i32 = arith.constant 0 : i32
    %c0_i32_0 = arith.constant 0 : i32
    %c0_i32_1 = arith.constant 0 : i32
    return %arg0, %c0_i32, %c0_i32_0 : i32, i32, i32
  }
  func.func @transform_2(%arg0: i32, %arg1: i32) -> (i32, i32) {
    %c0_i32 = arith.constant 0 : i32
    %c0_i32_0 = arith.constant 0 : i32
    %c0_i32_1 = arith.constant 0 : i32
    return %c0_i32, %c0_i32_0 : i32, i32
  }
  func.func @transform_3(%arg0: i32, %arg1: i32) -> (i32, i32) {
    %c0_i32 = arith.constant 0 : i32
    %c0_i32_0 = arith.constant 0 : i32
    %c0_i32_1 = arith.constant 0 : i32
    return %c0_i32, %c0_i32_0 : i32, i32
  }
  func.func @transform_4(%arg0: i32, %arg1: i32) -> (i32, i32) {
    %c0_i32 = arith.constant 0 : i32
    %c0_i32_0 = arith.constant 0 : i32
    %c0_i32_1 = arith.constant 0 : i32
    return %c0_i32, %c0_i32_0 : i32, i32
  }
  func.func @transform_5(%arg0: i32, %arg1: i32) -> (i32, i32) {
    %c0_i32 = arith.constant 0 : i32
    %c0_i32_0 = arith.constant 0 : i32
    %c0_i32_1 = arith.constant 0 : i32
    return %c0_i32, %c0_i32_0 : i32, i32
  }
  func.func @transform_6(%arg0: i32, %arg1: i32) -> (i32, i32) {
    %c0_i32 = arith.constant 0 : i32
    %c0_i32_0 = arith.constant 0 : i32
    %c0_i32_1 = arith.constant 0 : i32
    return %c0_i32, %c0_i32_0 : i32, i32
  }
  func.func @transform_7(%arg0: i32, %arg1: i32) -> (i32, i32) {
    %c0_i32 = arith.constant 0 : i32
    %c0_i32_0 = arith.constant 0 : i32
    %c0_i32_1 = arith.constant 0 : i32
    return %c0_i32, %c0_i32_0 : i32, i32
  }
  func.func @transform_8(%arg0: i32, %arg1: i32) -> (i32, i32, i32, i32) {
    %c0_i32 = arith.constant 0 : i32
    %c0_i32_0 = arith.constant 0 : i32
    %c0_i32_1 = arith.constant 0 : i32
    return %arg0, %c0_i32, %arg1, %c0_i32_0 : i32, i32, i32, i32
  }
  func.func @transform_9(%arg0: i32, %arg1: i32) -> (i32, i32, i32, i32) {
    %c0_i32 = arith.constant 0 : i32
    %c0_i32_0 = arith.constant 0 : i32
    %c0_i32_1 = arith.constant 0 : i32
    return %arg0, %c0_i32, %arg1, %c0_i32_0 : i32, i32, i32, i32
  }
  func.func @transform_10(%arg0: i32, %arg1: i32) -> (i32, i32, i32, i32) {
    %c0_i32 = arith.constant 0 : i32
    %c0_i32_0 = arith.constant 0 : i32
    %c0_i32_1 = arith.constant 0 : i32
    return %arg0, %c0_i32, %arg1, %c0_i32_0 : i32, i32, i32, i32
  }
  func.func @transform_11(%arg0: i32, %arg1: i32) -> (i32, i32, i32) {
    %c0_i32 = arith.constant 0 : i32
    %c0_i32_0 = arith.constant 0 : i32
    return %arg0, %arg1, %c0_i32 : i32, i32, i32
  }
}

</mosaic_0001>

<bundles_post_ra>
// kernel: tpu_custom_call.1
= control target key start
LH: loop header
LB: loop body
LE: loop exit
PB: predicated region body
PF: predicated region fallthrough
CT: control target
= control target key end

     0   :  { %s2894_s0 = inlined_call_operand.hbm [shape: f32[8,16,128], index: 0, kind: input, shape index: {}]   ;;  %s2895_s1 = inlined_call_operand.hbm [shape: f32[8,16,128], index: 1, kind: input, shape index: {}]   ;;  %s2896_s2 = inlined_call_operand.hbm [shape: f32[16,128], index: 2, kind: input, shape index: {}]   ;;  %s2897_s3 = inlined_call_operand.hbm [shape: f32[16,128], index: 3, kind: input, shape index: {}]   ;;  %s2898_s4 = inlined_call_operand.vmem [shape: bf16[16,16], index: 4, kind: input, shape index: {}]   ;;  %s2899_s5 = inlined_call_operand.vmem [shape: bf16[16,16], index: 5, kind: input, shape index: {}]   ;;  %s2900_s6 = inlined_call_operand.hbm [shape: bf16[128,128], index: 6, kind: input, shape index: {}]   ;;  %s2901_s7 = inlined_call_operand.hbm [shape: bf16[128,128], index: 7, kind: input, shape index: {}]   ;;  %s2902_s8 = inlined_call_operand.hbm [shape: f32[4,2,16,128], index: 8, kind: output, shape index: {0}]   ;;  %s2903_s9 = inlined_call_operand.hbm [shape: f32[4,2,16,128], index: 9, kind: output, shape index: {1}]   ;;  %s2904_s10 = inlined_call_operand.hbm [shape: f32[4,2,16,128], index: 10, kind: output, shape index: {2}]   ;;  %s2905_s11 = inlined_call_operand.hbm [shape: f32[4,16,128], index: 11, kind: output, shape index: {3}]  }
   0x1   :  { %2921 = sst [smem:[#allocation32_spill]] %s2894_s0 }
   0x2   :  { %2922 = sst [smem:[#allocation33_spill]] %s2896_s2 }
   0x3   :  { %2923 = sst [smem:[#allocation34_spill]] %s2897_s3 }
   0x4   :  { %2924 = sst [smem:[#allocation35_spill]] %s2900_s6 }
   0x5   :  { %2925 = sst [smem:[#allocation36_spill]] %s2901_s7 }
   0x6   :  { %2926 = sst [smem:[#allocation37_spill]] %s2902_s8 }
   0x7   :  { %2927 = sst [smem:[#allocation38_spill]] %s2903_s9 }
   0x8   :  { %2928 = sst [smem:[#allocation39_spill]] %s2904_s10 }
   0x9   :  { %2929 = sst [smem:[#allocation40_spill]] %s2905_s11 }
   0xa   :  { %17 = vsyncpa [#allocation5], 0 }
   0xb   :  { %19 = vsyncpa [#allocation5 + $0x1], 0 }
   0xc   :  { %20 = vsyncpa [#allocation8], 0 }
   0xd   :  { %22 = vsyncpa [#allocation8 + $0x1], 0 }
   0xe   :  { %23 = vsyncpa [#allocation11], 0 }
   0xf   :  { %24 = vsyncpa [#allocation14], 0 }
  0x10   :  { %25 = vsyncpa [#allocation6], 0 }
  0x11   :  { %27 = vsyncpa [#allocation6 + $0x1], 0 }
  0x12   :  { %28 = vsyncpa [#allocation17], 0 }
  0x13   :  { %30 = vsyncpa [#allocation17 + $0x1], 0 }
  0x14   :  { %31 = vsyncpa [#allocation20], 0 }
  0x15   :  { %33 = vsyncpa [#allocation20 + $0x1], 0  ;;  %s2325_s17 = smov 0   ;;  %s2327_s18 = smov 0  }
  0x16   :  { %s2329_s19 = smov 0   ;;  %s2331_s20 = smov 0  }
  0x17   :  { %s2333_s21 = smov 0   ;;  %s2335_s22 = smov 0  }
  0x18 LB: > { %2930 = sst [smem:[#allocation29_spill]] %s2225_s17  ;;  %s2356_s23 = sadd.s32 4294967295, %s2245_s22   ;;  %s2245_s22 = sphi %s2335_s22, %s39_s22   ;;  %s2241_s21 = sphi %s2333_s21, %s2969_s21   ;;  %s2237_s20 = sphi %s2331_s20, %s2968_s20   ;;  %s2233_s19 = sphi %s2329_s19, %s2967_s19   ;;  %s2229_s18 = sphi %s2327_s18, %s2966_s18   ;;  %s2225_s17 = sphi %s2325_s17, %s2965_s17  }
  0x19   : > { %2931 = sst [smem:[#allocation30_spill]] %s2237_s20  ;;  %s2906_s24 = sadd.s32 4294967294, %s2245_s22  }
  0x1a   : > { %p71_p0 = scmp.ne.s32.totalorder %s2229_s18, %s2225_s17  ;;  %p2910_p1 = scmp.eq.s32.totalorder %s2356_s23, 0 }
  0x1b   : > { %p255_p3 = scmp.eq.s32.totalorder %s2906_s24, 3  ;;  %p1492_p5 = scmp.ge.s32.totalorder %s2245_s22, 1 }
  0x1c   : > { %p2367_p4 = por %p2910_p1, %p71_p0  ;;  %p346_p7 = scmp.lt.s32.totalorder %s2245_s22, 5 }
  0x1d   : > { %p2372_p6 = por %p255_p3, %p71_p0  ;;  %s2247_s28 = smov [#allocation9]  }
  0x1e   : > { %s2932_s25 = scalar_select %p2367_p4, 1, 0 }
  0x1f   : > { %s2933_s26 = scalar_select %p2372_p6, 1, 0 }
  0x20   : > { %p2377_p8 = pnand %p1492_p5, %p346_p7  ;;  %s358_s29 = sshll.u32 %s2247_s28, 4  ;;  %s2381_s29 = int_to_ptr.vmem [resolvable:$true] %s358_s29 }
  0x21   : > { %2934 = sst [smem:[#allocation31_spill]] %s2933_s26  ;;  %s2248_s12 = smov [#allocation10]  }
  0x22   : > { %s2935_s27 = scalar_select %p2377_p8, 1, 0 }
  0x23   : > { %p1758_p9 = pneg %p2377_p8  ;;  %s371_s13 = sshll.u32 %s2248_s12, 4  ;;  %s2391_s13 = int_to_ptr.vmem [resolvable:$true] %s371_s13 }
  0x24   : > { %s2249_s14 = smov [#allocation12]   ;;  %s2937_s2 = sld [smem:[#allocation33_spill]] }
  0x25   : > { %p2387_p10 = pnand %p1758_p9, %p2910_p1  ;;  %s2393_s15 = sshll.u32 %s2249_s14, 4  ;;  %s391_s15 = int_to_ptr.vmem [resolvable:$true] %s2393_s15 }
  0x27   : > { %p2403_p12 = pneg %p2387_p10 }
  0x2a   : > { %s1883_s28 = scalar_lea.hbm %s2937_s2, 256 }
  0x2b   : > { %p1884_p11 = scmp.ne.s32.totalorder %s2937_s2, %s1883_s28  ;;  %p1890_p3 = scmp.lt.u32.totalorder %s1883_s28, %s2937_s2 }
  0x2d   : > { %p1886_p13 = pnand %p2403_p12, %p1884_p11 }
  0x2f   : > { %p1887_p0 = pneg %p1886_p13 }
  0x31   : > { %p1892_p5 = pnand %p1890_p3, %p1887_p0 }
  0x33   : > { %1895 = shalt.err (!%p1892_p5)
}
  0x34   : > { %s1896_s17 = scalar_lea.vmem %s2381_s29, 256  ;;  %p1904_p2 = scmp.lt.s32.totalorder %s2381_s29, %s2381_s29 }
  0x35   : > { %p1897_p7 = scmp.ne.s32.totalorder %s2381_s29, %s1896_s17  ;;  %p1905_p6 = scmp.lt.s32.totalorder %s1896_s17, %s1896_s17 }
  0x37   : > { %p1899_p9 = pnand %p1897_p7, %p2403_p12  ;;  %p1906_p11 = por %p1905_p6, %p1904_p2 }
  0x39   : > { %p1900_p1 = pneg %p1899_p9 }
  0x3b   : > { %p1907_p13 = pnand %p1906_p11, %p1900_p1 }
  0x3d   : > { %1910 = shalt.err (!%p1907_p13)
}
  0x3e   : > { %s2917_s24 = smov 128   ;;  %s2919_s26 = smov 8  }
  0x3f   : > { %1761 = dma.hbm_to_vmem [thread:$0]  (!%p2387_p10), %s2937_s2, 256, %s2381_s29, [#allocation8], %s2917_s24, %s2917_s24, %s2919_s26  }
  0x40   : > { %s2939_s3 = sld [smem:[#allocation34_spill]] }
  0x46   : > { %s1911_s17 = scalar_lea.hbm %s2939_s3, 256 }
  0x47   : > { %p1912_p1 = scmp.ne.s32.totalorder %s2939_s3, %s1911_s17  ;;  %p1918_p0 = scmp.lt.u32.totalorder %s1911_s17, %s2939_s3 }
  0x49   : > { %p1914_p2 = pnand %p1912_p1, %p2403_p12 }
  0x4b   : > { %p1915_p6 = pneg %p1914_p2 }
  0x4d   : > { %p1920_p3 = pnand %p1918_p0, %p1915_p6 }
  0x4f   : > { %1923 = shalt.err (!%p1920_p3)
}
  0x50   : > { %s1924_s29 = scalar_lea.vmem %s2391_s13, 256  ;;  %p1932_p11 = scmp.lt.s32.totalorder %s2391_s13, %s2391_s13 }
  0x51   : > { %p1925_p5 = scmp.ne.s32.totalorder %s2391_s13, %s1924_s29  ;;  %p1933_p13 = scmp.lt.s32.totalorder %s1924_s29, %s1924_s29 }
  0x53   : > { %p1927_p7 = pnand %p1925_p5, %p2403_p12  ;;  %p1934_p1 = por %p1933_p13, %p1932_p11 }
  0x55   : > { %p1928_p9 = pneg %p1927_p7 }
  0x57   : > { %p1935_p2 = pnand %p1934_p1, %p1928_p9 }
  0x59   : > { %1938 = shalt.err (!%p1935_p2)
}
  0x5a   : > { %1764 = dma.hbm_to_vmem [thread:$0]  (!%p2387_p10), %s2939_s3, 256, %s2391_s13, [#allocation11], %s2917_s24, %s2917_s24, %s2919_s26  }
  0x5b   : > { %s2940_s6 = sld [smem:[#allocation35_spill]] }
  0x61   : > { %s1939_s16 = scalar_lea.hbm %s2940_s6, 1024 }
  0x62   : > { %p1940_p6 = scmp.ne.s32.totalorder %s2940_s6, %s1939_s16  ;;  %p1946_p5 = scmp.lt.u32.totalorder %s1939_s16, %s2940_s6 }
  0x64   : > { %p1942_p0 = pnand %p1940_p6, %p2403_p12 }
  0x66   : > { %p1943_p3 = pneg %p1942_p0 }
  0x68   : > { %p1948_p7 = pnand %p1946_p5, %p1943_p3 }
  0x6a   : > { %1951 = shalt.err (!%p1948_p7)
}
  0x6b   : > { %s1952_s29 = scalar_lea.vmem %s391_s15, 1024  ;;  %p1960_p1 = scmp.lt.s32.totalorder %s391_s15, %s391_s15 }
  0x6c   : > { %p1953_p9 = scmp.ne.s32.totalorder %s391_s15, %s1952_s29  ;;  %p1961_p2 = scmp.lt.s32.totalorder %s1952_s29, %s1952_s29 }
  0x6e   : > { %p1955_p11 = pnand %p1953_p9, %p2403_p12  ;;  %p1962_p4 = por %p1961_p2, %p1960_p1 }
  0x70   : > { %p1956_p13 = pneg %p1955_p11 }
  0x72   : > { %p1963_p8 = pnand %p1962_p4, %p1956_p13 }
  0x74   : > { %1966 = shalt.err (!%p1963_p8)
}
  0x75   : > { %s2252_s13 = smov 64   ;;  %s2253_s8 = smov 4  }
  0x76   : > { %1767 = dma.hbm_to_vmem [thread:$0]  (!%p2387_p10), %s2940_s6, 1024, %s391_s15, [#allocation11], %s2252_s13, %s2252_s13, %s2253_s8  }
  0x77   : > { %s2254_s20 = smov [#allocation13]   ;;  %s2941_s7 = sld [smem:[#allocation36_spill]] }
  0x78   : > { %s403_s16 = sshll.u32 %s2254_s20, 4  ;;  %s404_s16 = int_to_ptr.vmem [resolvable:$true] %s403_s16 }
  0x7d   : > { %s1967_s14 = scalar_lea.hbm %s2941_s7, 1024 }
  0x7e   : > { %p1968_p4 = scmp.ne.s32.totalorder %s2941_s7, %s1967_s14  ;;  %p1974_p0 = scmp.lt.u32.totalorder %s1967_s14, %s2941_s7 }
  0x80   : > { %p1970_p8 = pnand %p1968_p4, %p2403_p12 }
  0x82   : > { %p1971_p6 = pneg %p1970_p8 }
  0x84   : > { %p1976_p3 = pnand %p1974_p0, %p1971_p6 }
  0x86   : > { %1979 = shalt.err (!%p1976_p3)
}
  0x87   : > { %s1980_s15 = scalar_lea.vmem %s404_s16, 1024  ;;  %p1988_p11 = scmp.lt.s32.totalorder %s404_s16, %s404_s16 }
  0x88   : > { %p1981_p5 = scmp.ne.s32.totalorder %s404_s16, %s1980_s15  ;;  %p1989_p13 = scmp.lt.s32.totalorder %s1980_s15, %s1980_s15 }
  0x8a   : > { %p1983_p7 = pnand %p1981_p5, %p2403_p12  ;;  %p1990_p1 = por %p1989_p13, %p1988_p11 }
  0x8c   : > { %p1984_p9 = pneg %p1983_p7 }
  0x8e   : > { %p1991_p2 = pnand %p1990_p1, %p1984_p9 }
  0x90   : > { %1994 = shalt.err (!%p1991_p2)
}
  0x91   : > { %1770 = dma.hbm_to_vmem [thread:$0]  (!%p2387_p10), %s2941_s7, 1024, %s404_s16, [#allocation14], %s2252_s13, %s2252_s13, %s2253_s8  }
  0x92   : > { %s51_s11 = sadd.s32 1, %s2241_s21  ;;  %s58_s24 = sadd.s32 1, %s2233_s19 }
  0x93   : > { %p53_p12 = scmp.ge.s32.totalorder %s51_s11, 4  ;;  %p65_p4 = scmp.ne.s32.totalorder %s2233_s19, %s2229_s18 }
  0x94   : > { %p66_p8 = scmp.eq.s32.totalorder %s2245_s22, 0  ;;  %p1795_p6 = scmp.lt.s32.totalorder %s2245_s22, 4 }
  0x95   : > { %s2971_s11 = smov (%p53_p12, %s51_s11), 0  ;;  %p2942_p3 = scmp.eq.s32.totalorder %s2356_s23, 3 }
  0x96   : > { %p67_p0 = por %p66_p8, %p65_p4  ;;  %s55_s26 = ssub.s32 %s2241_s21, %s2971_s11 }
  0x97   : > { %p2500_p5 = por %p2942_p3, %p65_p4  ;;  %s417_s20 = sand.u32 1, %s2233_s19  }
  0x98   : > { %p56_p7 = scmp.eq.s32.totalorder %s55_s26, 0  ;;  %s2507_s13 = sshll.u32 %s417_s20, 5 }
  0x99   : > { %s1567_s8 = sshll.u32 %s2241_s21, 9  ;;  %s2944_s0 = sld [smem:[#allocation32_spill]] }
  0x9a   : > { %s2511_s16 = scalar_select %p56_p7, %s2233_s19, %s58_s24  }
  0x9b   : > { %s421_s17 = scalar_lea.vmem [#allocation4], %s2507_s13  ;;  %p2521_p10 = pnand %p1795_p6, %p67_p0 }
  0x9c   : > { %s429_s29 = sshll.u32 %s421_s17, 4  ;;  %s2530_s24 = scalar_lea.hbm %s2895_s1, %s1567_s8  ;;  %s2525_s29 = int_to_ptr.vmem [resolvable:$true] %s429_s29 }
  0x9d   : > { %s2532_s26 = scalar_lea.sflag [#allocation5], %s417_s20  ;;  %p1997_p11 = pneg %p2521_p10 }
  0x9f   : > { %s2516_s14 = scalar_lea.hbm %s2944_s0, %s1567_s8  ;;  %s2000_s2 = scalar_lea.hbm %s2944_s0, 2048 }
  0xa0   : > { %s1995_s28 = scalar_lea.hbm %s2516_s14, 512  ;;  %p2001_p2 = scmp.lt.u32.totalorder %s2516_s14, %s2944_s0 }
  0xa1   : > { %p1996_p9 = scmp.ne.s32.totalorder %s2516_s14, %s1995_s28  ;;  %p2002_p12 = scmp.lt.u32.totalorder %s2000_s2, %s1995_s28 }
  0xa2   : > { %p2004_p8 = scmp.lt.u32.totalorder %s1995_s28, %s2516_s14 }
  0xa3   : > { %p1998_p13 = pnand %p1997_p11, %p1996_p9  ;;  %p2003_p4 = por %p2002_p12, %p2001_p2 }
  0xa5   : > { %p1999_p1 = pneg %p1998_p13  ;;  %p2005_p6 = por %p2004_p8, %p2003_p4 }
  0xa7   : > { %p2006_p0 = pnand %p2005_p6, %p1999_p1 }
  0xa9   : > { %2009 = shalt.err (!%p2006_p0)
}
  0xaa   : > { %s2010_s20 = scalar_lea.vmem %s2525_s29, 512  ;;  %s2255_s8 = smov [#allocation4]  }
  0xab   : > { %p2011_p3 = scmp.ne.s32.totalorder %s2525_s29, %s2010_s20  ;;  %s2015_s9 = sshll.u32 %s2255_s8, 4  ;;  %s2016_s9 = int_to_ptr.vmem [resolvable:$false] %s2015_s9 }
  0xac   : > { %s2017_s3 = scalar_lea.vmem %s2016_s9, 1024  ;;  %p2018_p13 = scmp.lt.s32.totalorder %s2525_s29, %s2016_s9 }
  0xad   : > { %p2013_p7 = pnand %p2011_p3, %p1997_p11  ;;  %p2019_p2 = scmp.lt.s32.totalorder %s2017_s3, %s2010_s20 }
  0xaf   : > { %p2014_p9 = pneg %p2013_p7  ;;  %p2020_p12 = por %p2019_p2, %p2018_p13 }
  0xb1   : > { %p2021_p4 = pnand %p2020_p12, %p2014_p9 }
  0xb3   : > { %2024 = shalt.err (!%p2021_p4)
}
  0xb4   : > { %s2946_s2 = smov 8   ;;  %s2947_s6 = smov 128  }
  0xb5   : > { %1774 = dma.hbm_to_vmem [thread:$0]  (!%p2521_p10), %s2516_s14, 512, %s2525_s29, %s2532_s26, %s2947_s6, %s2947_s6, %s2946_s2  }
  0xb6   : > { %s443_s10 = scalar_lea.vmem [#allocation7], %s2507_s13  ;;  %s439_s12 = sand.u32 1, %s2245_s22  }
  0xb7   : > { %s451_s28 = sshll.u32 %s443_s10, 4  ;;  %s2567_s17 = scalar_lea.sflag [#allocation8], %s439_s12  ;;  %s2565_s28 = int_to_ptr.vmem [resolvable:$true] %s451_s28 }
  0xb8   : > { %s2025_s20 = scalar_lea.hbm %s2530_s24, 512  ;;  %s2030_s3 = scalar_lea.hbm %s2895_s1, 2048 }
  0xb9   : > { %p2026_p1 = scmp.ne.s32.totalorder %s2530_s24, %s2025_s20  ;;  %p2031_p0 = scmp.lt.u32.totalorder %s2530_s24, %s2895_s1 }
  0xba   : > { %p2032_p3 = scmp.lt.u32.totalorder %s2030_s3, %s2025_s20  ;;  %p2034_p9 = scmp.lt.u32.totalorder %s2025_s20, %s2530_s24 }
  0xbb   : > { %p2028_p8 = pnand %p2026_p1, %p1997_p11 }
  0xbc   : > { %p2033_p7 = por %p2032_p3, %p2031_p0 }
  0xbd   : > { %p2029_p6 = pneg %p2028_p8 }
  0xbe   : > { %p2035_p13 = por %p2034_p9, %p2033_p7 }
  0xc0   : > { %p2036_p2 = pnand %p2035_p13, %p2029_p6 }
  0xc2   : > { %2039 = shalt.err (!%p2036_p2)
}
  0xc3   : > { %s2040_s13 = scalar_lea.vmem %s2565_s28, 512  ;;  %s2256_s14 = smov [#allocation7]  }
  0xc4   : > { %p2041_p12 = scmp.ne.s32.totalorder %s2565_s28, %s2040_s13  ;;  %s2045_s29 = sshll.u32 %s2256_s14, 4  ;;  %s2046_s29 = int_to_ptr.vmem [resolvable:$false] %s2045_s29 }
  0xc5   : > { %s2047_s0 = scalar_lea.vmem %s2046_s29, 1024  ;;  %p2048_p8 = scmp.lt.s32.totalorder %s2565_s28, %s2046_s29 }
  0xc6   : > { %p2043_p4 = pnand %p2041_p12, %p1997_p11  ;;  %p2049_p0 = scmp.lt.s32.totalorder %s2047_s0, %s2040_s13 }
  0xc8   : > { %p2044_p1 = pneg %p2043_p4  ;;  %p2050_p3 = por %p2049_p0, %p2048_p8 }
  0xca   : > { %p2051_p7 = pnand %p2050_p3, %p2044_p1 }
  0xcc   : > { %2054 = shalt.err (!%p2051_p7)
}
  0xcd   : > { %1777 = dma.hbm_to_vmem [thread:$0]  (!%p2521_p10), %s2530_s24, 512, %s2565_s28, %s2567_s17, %s2947_s6, %s2947_s6, %s2946_s2  }
  0xce   : > { %p2948_p11 = scmp.ne.s32.totalorder %s2935_s27, 0 }
  0xcf   : > { %s2599_s7 = sand.u32 (!%p2948_p11), 1, %s2229_s18   ;;  %p2949_p6 = scmp.ne.s32.totalorder (!%p2948_p11), %s2932_s25, 0 }
  0xd0   : > { %463 = sbr.rel (%p2948_p11) target bundleno = 578 (0x242), region = 52  ;;  %s2602_s26 = sshll.u32 (!%p2948_p11), %s2599_s7, 5 }
  0xd1   : > { %s466_s15 = scalar_lea.sflag (!%p2948_p11), [#allocation5], %s2599_s7  ;;  %s2606_s10 = scalar_lea.vmem (!%p2948_p11), [#allocation4], %s2602_s26 }
  0xd7   : > { %2192 = dma.done.wait (%p2949_p6), %s466_s15, 512  }
  0xd8   : > { %2194 = vsyncadd (%p2949_p6), %s466_s15, 4294966784  ;;  %s474_s27 = sand.u32 1, %s2356_s23   ;;  %s2616_s2 = scalar_lea.vmem [#allocation7], %s2602_s26 }
  0xd9   : > { %s475_s24 = scalar_lea.sflag [#allocation8], %s474_s27 }
  0xda   : > { %2196 = dma.done.wait (%p2949_p6), %s475_s24, 512  }
  0xdb   : > { %2198 = vsyncadd (%p2949_p6), %s475_s24, 4294966784  ;;  %p2950_p10 = scmp.eq.s32.totalorder %s2356_s23, 0 }
  0xdd   : > { %2200 = dma.done.wait (%p2950_p10), [#allocation8], 256   ;;  %p2951_p9 = pmov %p2950_p10 }
  0xdf   : > { %2202 = vsyncadd (%p2951_p9), [#allocation8], 4294967040  ;;  %p2952_p13 = pmov %p2951_p9 }
  0xe0   : > { %p2953_p2 = pmov %p2951_p9 }
  0xe1   : > { %2204 = dma.done.wait (%p2952_p13), [#allocation11], 1280  }
  0xe2   : > { %2206 = vsyncadd (%p2953_p2), [#allocation11], 4294966016  ;;  %p2954_p12 = pmov %p2953_p2 }
  0xe3   : > { %p2955_p4 = pmov %p2953_p2 }
  0xe4   : > { %2208 = dma.done.wait (%p2954_p12), [#allocation14], 1024  }
  0xe5   : > { %2210 = vsyncadd (%p2955_p4), [#allocation14], 4294966272  ;;  %v2257_v0 = vmov 0.0   ;;  %vm2258_vm0 = vmmov 0   ;;  %v564_v1 = vld [vmem:[#allocation9] sm:$0xff]  ;;  %v565_v2 = vld [vmem:[#allocation9 + $0x8] sm:$0xff] }
  0xe6   : > { %1618 = vmatprep.subr.bf16.mxu1 %v2257_v0  ;;  %1630 = vmatprep.subr.bf16.mxu0 %v2257_v0  ;;  %v566_v3 = vld [vmem:[#allocation10] sm:$0xff]  ;;  %v567_v4 = vld [vmem:[#allocation10 + $0x8] sm:$0xff]  ;;  %v568_v5 = vld [vmem:[%s2606_s10] sm:$0xff]  ;;  %s2651_s25 = scalar_lea.vmem [#allocation15], %s2602_s26  ;;  %vm631_vm1 = vcmask 130048   ;;  %s2956_s20 = sld [smem:[#allocation30_spill]] }
  0xe7   : > { %1620 = vmatprep.mubr.msk.bf16.mxu1 %vm2258_vm0, %v2257_v0  ;;  %1632 = vmatprep.mubr.msk.bf16.mxu0 %vm2258_vm0, %v2257_v0  ;;  %v569_v6 = vld [vmem:[%s2606_s10 + $0x8] sm:$0xff]  ;;  %v570_v7 = vmul.f32 %v568_v5, %v564_v1  ;;  %v572_v9 = vld [vmem:[%s2616_s2] sm:$0xff]  ;;  %v1517_v13 = vld [vmem:[%s2606_s10 + $0x10] sm:$0xff]  ;;  %s2957_s13 = sld [smem:[#allocation37_spill]]  ;;  %s1175_s29 = sshll.u32 %s2651_s25, 4  ;;  %s2733_s29 = int_to_ptr.vmem [resolvable:$true] %s1175_s29 }
  0xe8   : > { %v571_v8 = vmul.f32 %v569_v6, %v565_v2  ;;  %v573_v10 = vld [vmem:[%s2616_s2 + $0x8] sm:$0xff]  ;;  %v574_v11 = vmul.f32 %v572_v9, %v566_v3  ;;  %v1518_v16 = vld [vmem:[%s2606_s10 + $0x18] sm:$0xff]  ;;  %v585_v17 = vmul.f32 %v1517_v13, %v564_v1  ;;  %v1519_v18 = vld [vmem:[%s2616_s2 + $0x10] sm:$0xff]  ;;  %s1145_s0 = scalar_lea.sflag [#allocation6], %s2599_s7  ;;  %s2055_s15 = scalar_lea.vmem %s2733_s29, 512 }
  0xe9   : > { %v575_v12 = vmul.f32 %v573_v10, %v567_v4  ;;  %v1520_v19 = vld [vmem:[%s2616_s2 + $0x18] sm:$0xff]  ;;  %v586_v20 = vmul.f32 %v1518_v16, %v565_v2  ;;  %v590_v21 = vmul.f32 %v1519_v18, %v566_v3  ;;  %v1861_v24 = vld [vmem:[%s2898_s4] sm:$0xff]   ;;  %v1864_v30 = vld [vmem:[#allocation12 + $0x8] sm:$0xff]   ;;  %p2056_p1 = scmp.ne.s32.totalorder %s2733_s29, %s2055_s15  ;;  %s2259_s10 = smov [#allocation15]  }
  0xea   : > { %v576_v14 = vadd.f32 %v574_v11, %v570_v7  ;;  %v591_v22 = vmul.f32 %v1520_v19, %v567_v4  ;;  %v1862_v25 = vld [vmem:[%s2899_s5] sm:$0xff]   ;;  %v1865_v31 = vld [vmem:[#allocation12 + $0x10] sm:$0xff]   ;;  %v1866_v32 = vld [vmem:[#allocation12 + $0x18] sm:$0xff]   ;;  %s2059_s24 = sshll.u32 %s2259_s10, 4  ;;  %s2060_s24 = int_to_ptr.vmem [resolvable:$false] %s2059_s24 }
  0xeb   : > { %v577_v15 = vadd.f32 %v575_v12, %v571_v8  ;;  %v592_v26 = vadd.f32 %v590_v21, %v585_v17  ;;  %v1863_v29 = vld [vmem:[#allocation12] sm:$0xff]   ;;  %v1868_v34 = vld [vmem:[#allocation12 + $0x28] sm:$0xff]   ;;  %v1869_v35 = vld [vmem:[#allocation12 + $0x30] sm:$0xff]   ;;  %p2057_p8 = pnand %p2056_p1, %p2500_p5  ;;  %s2061_s2 = scalar_lea.vmem %s2060_s24, 1024 }
  0xec   : > { %604 = vst [vmem:[%s2651_s25] sm:$0xff] %v576_v14  ;;  %v593_v27 = vadd.f32 %v591_v22, %v586_v20  ;;  %v1867_v33 = vld [vmem:[#allocation12 + $0x20] sm:$0xff]   ;;  %v1870_v36 = vld [vmem:[#allocation12 + $0x38] sm:$0xff]   ;;  %v1872_v38 = vld [vmem:[#allocation13 + $0x8] sm:$0xff]   ;;  %s2724_s8 = sshll.u32 %s2956_s20, 9  ;;  %p2062_p3 = scmp.lt.s32.totalorder %s2733_s29, %s2060_s24 }
  0xed   : > { %v2648_v23 = vpack.c.bf16 %v577_v15, %v576_v14  ;;  %605 = vst [vmem:[%s2651_s25 + $0x8] sm:$0xff] %v577_v15  ;;  %1523 = vst [vmem:[%s2651_s25 + $0x10] sm:$0xff] %v592_v26  ;;  %v1871_v37 = vld [vmem:[#allocation13] sm:$0xff]   ;;  %v1873_v39 = vld [vmem:[#allocation13 + $0x10] sm:$0xff]   ;;  %s2730_s14 = scalar_lea.hbm %s2957_s13, %s2724_s8  ;;  %p2058_p0 = pneg %p2057_p8 }
  0xee   : > { %v2664_v28 = vpack.c.bf16 %v593_v27, %v592_v26  ;;  %1524 = vst [vmem:[%s2651_s25 + $0x18] sm:$0xff] %v593_v27  ;;  %v1874_v40 = vld [vmem:[#allocation13 + $0x18] sm:$0xff]   ;;  %v1875_v41 = vld [vmem:[#allocation13 + $0x20] sm:$0xff]   ;;  %v1876_v42 = vld [vmem:[#allocation13 + $0x28] sm:$0xff]   ;;  %p2063_p7 = scmp.lt.s32.totalorder %s2061_s2, %s2055_s15 }
  0xef   : > { %1619 = vmatpush3.bf16.msra.mxu1 %v2648_v23  ;;  %1631 = vmatpush3.bf16.msra.mxu0 %v2648_v23  ;;  %v1877_v43 = vld [vmem:[#allocation13 + $0x30] sm:$0xff]   ;;  %v1878_v44 = vld [vmem:[#allocation13 + $0x38] sm:$0xff]  }
  0xf0   : > { %1636 = vmatprep.subr.bf16.mxu0 %v2257_v0  ;;  %1624 = vmatprep.subr.bf16.mxu1 %v2257_v0  ;;  %p2064_p11 = por %p2063_p7, %p2062_p3 }
  0xf2   : > { %1621 = vmatmul.mubr.msk.bf16.vlgmr.msra.gmra.mrb[0].mxu1 %vm631_vm1, %v1861_v24  ;;  %1633 = vmatmul.mubr.msk.bf16.vlgmr.msra.gmra.mrb[0].mxu0 %vm631_vm1, %v1862_v25  ;;  %p2065_p6 = pnand %p2064_p11, %p2058_p0 }
  0xf3   : > { %1637 = vmatpush3.bf16.msra.mxu0 %v2664_v28  ;;  %1625 = vmatpush3.bf16.msra.mxu1 %v2664_v28 }
  0xf4   : > { %1626 = vmatprep.mubr.msk.bf16.mxu1 %vm2258_vm0, %v2257_v0  ;;  %1682 = vmatprep.subr.bf16.mxu1 %v2257_v0 }
  0xf5   : > { %1638 = vmatprep.mubr.msk.bf16.mxu0 %vm2258_vm0, %v2257_v0  ;;  %1642 = vmatprep.subr.bf16.mxu0 %v2257_v0 }
  0xfa   : > { %1627 = vmatmul.mubr.msk.bf16.vlgmr.msra.gmra.mrb[4].mxu1 %vm631_vm1, %v1862_v25 }
  0xfb   : > { %1683 = vmatpush3.bf16.msra.mxu1 %v1863_v29  ;;  %1698 = vmatprep.mubr.msk.bf16.mxu1 %vm2258_vm0, %v2257_v0 }
  0xfc   : > { %1684 = vmatprep.subr.bf16.mxu1 %v2257_v0 }
  0xfe   : > { %1639 = vmatmul.mubr.msk.bf16.vlgmr.msra.gmra.mrb[0].mxu0 %vm631_vm1, %v1861_v24 }
  0xff   : > { %1643 = vmatpush3.bf16.msra.mxu0 %v1863_v29  ;;  %1685 = vmatpush3.bf16.msra.mxu1 %v1864_v30 }
 0x100   : > { %1644 = vmatprep.subr.bf16.mxu0 %v2257_v0  ;;  %1686 = vmatprep.subr.bf16.mxu1 %v2257_v0 }
 0x101   : > { %1658 = vmatprep.mubr.msk.bf16.mxu0 %vm2258_vm0, %v2257_v0 }
 0x103   : > { %1645 = vmatpush3.bf16.msra.mxu0 %v1864_v30  ;;  %1687 = vmatpush3.bf16.msra.mxu1 %v1865_v31 }
 0x104   : > { %1646 = vmatprep.subr.bf16.mxu0 %v2257_v0  ;;  %1688 = vmatprep.subr.bf16.mxu1 %v2257_v0 }
 0x107   : > { %1647 = vmatpush3.bf16.msra.mxu0 %v1865_v31  ;;  %1689 = vmatpush3.bf16.msra.mxu1 %v1866_v32 }
 0x108   : > { %1648 = vmatprep.subr.bf16.mxu0 %v2257_v0  ;;  %1690 = vmatprep.subr.bf16.mxu1 %v2257_v0 }
 0x10b   : > { %1649 = vmatpush3.bf16.msra.mxu0 %v1866_v32  ;;  %1691 = vmatpush3.bf16.msra.mxu1 %v1867_v33 }
 0x10c   : > { %1650 = vmatprep.subr.bf16.mxu0 %v2257_v0  ;;  %1692 = vmatprep.subr.bf16.mxu1 %v2257_v0 }
 0x10f   : > { %1651 = vmatpush3.bf16.msra.mxu0 %v1867_v33  ;;  %1693 = vmatpush3.bf16.msra.mxu1 %v1868_v34 }
 0x110   : > { %1652 = vmatprep.subr.bf16.mxu0 %v2257_v0  ;;  %1694 = vmatprep.subr.bf16.mxu1 %v2257_v0 }
 0x113   : > { %1653 = vmatpush3.bf16.msra.mxu0 %v1868_v34  ;;  %1695 = vmatpush3.bf16.msra.mxu1 %v1869_v35 }
 0x114   : > { %1654 = vmatprep.subr.bf16.mxu0 %v2257_v0  ;;  %1696 = vmatprep.subr.bf16.mxu1 %v2257_v0 }
 0x117   : > { %1655 = vmatpush3.bf16.msra.mxu0 %v1869_v35  ;;  %1697 = vmatpush3.bf16.msra.mxu1 %v1870_v36 }
 0x118   : > { %1656 = vmatprep.subr.bf16.mxu0 %v2257_v0  ;;  %1702 = vmatprep.subr.bf16.mxu1 %v2257_v0 }
 0x11a   : > { %1699 = vmatmul.mubr.bf16.vlgmr.msra.gmra.mrb[8].mxu1 %v2664_v28 }
 0x11b   : > { %1657 = vmatpush3.bf16.msra.mxu0 %v1870_v36  ;;  %1703 = vmatpush3.bf16.msra.mxu1 %v1871_v37 }
 0x11c   : > { %1662 = vmatprep.subr.bf16.mxu0 %v2257_v0  ;;  %1704 = vmatprep.subr.bf16.mxu1 %v2257_v0 }
 0x11d   : > { %1718 = vmatprep.mubr.msk.bf16.mxu1 %vm2258_vm0, %v2257_v0 }
 0x11e   : > { %1659 = vmatmul.mubr.bf16.vlgmr.msra.gmra.mrb[4].mxu0 %v2648_v23 }
 0x11f   : > { %1663 = vmatpush3.bf16.msra.mxu0 %v1871_v37  ;;  %1705 = vmatpush3.bf16.msra.mxu1 %v1872_v38 }
 0x120   : > { %1664 = vmatprep.subr.bf16.mxu0 %v2257_v0  ;;  %1706 = vmatprep.subr.bf16.mxu1 %v2257_v0 }
 0x121   : > { %1678 = vmatprep.mubr.msk.bf16.mxu0 %vm2258_vm0, %v2257_v0 }
 0x123   : > { %1665 = vmatpush3.bf16.msra.mxu0 %v1872_v38  ;;  %1707 = vmatpush3.bf16.msra.mxu1 %v1873_v39 }
 0x124   : > { %1666 = vmatprep.subr.bf16.mxu0 %v2257_v0  ;;  %1708 = vmatprep.subr.bf16.mxu1 %v2257_v0 }
 0x127   : > { %1667 = vmatpush3.bf16.msra.mxu0 %v1873_v39  ;;  %1709 = vmatpush3.bf16.msra.mxu1 %v1874_v40 }
 0x128   : > { %1668 = vmatprep.subr.bf16.mxu0 %v2257_v0  ;;  %1710 = vmatprep.subr.bf16.mxu1 %v2257_v0 }
 0x12b   : > { %1669 = vmatpush3.bf16.msra.mxu0 %v1874_v40  ;;  %1711 = vmatpush3.bf16.msra.mxu1 %v1875_v41 }
 0x12c   : > { %1670 = vmatprep.subr.bf16.mxu0 %v2257_v0  ;;  %1712 = vmatprep.subr.bf16.mxu1 %v2257_v0 }
 0x12f   : > { %1671 = vmatpush3.bf16.msra.mxu0 %v1875_v41  ;;  %1713 = vmatpush3.bf16.msra.mxu1 %v1876_v42 }
 0x130   : > { %1672 = vmatprep.subr.bf16.mxu0 %v2257_v0  ;;  %1714 = vmatprep.subr.bf16.mxu1 %v2257_v0 }
 0x133   : > { %1673 = vmatpush3.bf16.msra.mxu0 %v1876_v42  ;;  %1715 = vmatpush3.bf16.msra.mxu1 %v1877_v43 }
 0x134   : > { %1674 = vmatprep.subr.bf16.mxu0 %v2257_v0  ;;  %1716 = vmatprep.subr.bf16.mxu1 %v2257_v0 }
 0x137   : > { %1675 = vmatpush3.bf16.msra.mxu0 %v1877_v43  ;;  %1717 = vmatpush3.bf16.msra.mxu1 %v1878_v44 }
 0x138   : > { %1676 = vmatprep.subr.bf16.mxu0 %v2257_v0 }
 0x13a   : > { %1719 = vmatmul.mubr.bf16.vlgmr.msra.gmra.mrb[8].mxu1 %v2648_v23 }
 0x13b   : > { %1677 = vmatpush3.bf16.msra.mxu0 %v1878_v44 }
 0x13e   : > { %1679 = vmatmul.mubr.bf16.vlgmr.msra.gmra.mrb[8].mxu0 %v2664_v28 }
 0x13f   : > { %2068 = shalt.err (!%p2065_p6)
}
 0x140   : > { %s2069_s25 = scalar_lea.hbm %s2730_s14, 512  ;;  %s2073_s12 = scalar_lea.hbm %s2957_s13, 2048 }
 0x141   : > { %p2070_p10 = scmp.ne.s32.totalorder %s2730_s14, %s2069_s25  ;;  %p2074_p2 = scmp.lt.u32.totalorder %s2730_s14, %s2957_s13 }
 0x142   : > { %p2075_p12 = scmp.lt.u32.totalorder %s2073_s12, %s2069_s25  ;;  %p2077_p1 = scmp.lt.u32.totalorder %s2069_s25, %s2730_s14 }
 0x143   : > { %p2071_p9 = pnand %p2070_p10, %p2500_p5 }
 0x144   : > { %p2076_p4 = por %p2075_p12, %p2074_p2 }
 0x145   : > { %p2072_p13 = pneg %p2071_p9 }
 0x146   : > { %p2078_p8 = por %p2077_p1, %p2076_p4 }
 0x148   : > { %p2079_p0 = pnand %p2078_p8, %p2072_p13 }
 0x14a   : > { %2082 = shalt.err (!%p2079_p0)
}
 0x14b   : > { %s2260_s3 = smov 128   ;;  %s2261_s15 = smov 8  }
 0x14c   : > { %1750 = dma.vmem_to_hbm [thread:$0]  (%p2500_p5), %s2733_s29, 512, %s2730_s14, %s1145_s0, %s2260_s3, %s2260_s3, %s2261_s15  }
 0x14d   : > { %s538_s10 = scalar_lea.vmem [#allocation16], %s2602_s26  ;;  %s2958_s0 = sld [smem:[#allocation38_spill]] }
 0x14e   : > { %s1193_s24 = sshll.u32 %s538_s10, 4  ;;  %s2773_s25 = scalar_lea.sflag [#allocation17], %s474_s27  ;;  %s2763_s24 = int_to_ptr.vmem [resolvable:$true] %s1193_s24 }
 0x14f   : > { %s2083_s6 = scalar_lea.vmem %s2763_s24, 512  ;;  %s2262_s28 = smov [#allocation16]  }
 0x150   : > { %p2084_p3 = scmp.ne.s32.totalorder %s2763_s24, %s2083_s6  ;;  %s2087_s12 = sshll.u32 %s2262_s28, 4  ;;  %s2088_s12 = int_to_ptr.vmem [resolvable:$false] %s2087_s12 }
 0x151   : > { %s2089_s17 = scalar_lea.vmem %s2088_s12, 1024  ;;  %p2090_p6 = scmp.lt.s32.totalorder %s2763_s24, %s2088_s12 }
 0x152   : > { %p2085_p7 = pnand %p2084_p3, %p2500_p5  ;;  %p2091_p10 = scmp.lt.s32.totalorder %s2089_s17, %s2083_s6 }
 0x153   : > { %s2769_s2 = scalar_lea.hbm %s2958_s0, %s2724_s8 }
 0x154   : > { %p2086_p11 = pneg %p2085_p7  ;;  %p2092_p9 = por %p2091_p10, %p2090_p6 }
 0x156   : > { %p2093_p13 = pnand %p2092_p9, %p2086_p11 }
 0x1c5   : > { %v669_v45 = vpop.f32.mrb[0].mxu1 }
 0x1c6   : > { %v1622_v46 = vpop.f32.mrb[1].mxu1 }
 0x1c7   : > { %v672_v47 = vpop.f32.mrb[2].mxu1 }
 0x1c8   : > { %v1623_v48 = vpop.f32.mrb[3].mxu1 }
 0x1cd   : > { %v718_v49 = vpop.f32.mrb[4].mxu1 }
 0x1ce   : > { %v725_v50 = vsub.f32 %v669_v45, %v718_v49  ;;  %v1628_v51 = vpop.f32.mrb[5].mxu1 }
 0x1cf   : > { %v721_v52 = vpop.f32.mrb[6].mxu1 }
 0x1d0   : > { %809 = vst [vmem:[%s538_s10] sm:$0xff] %v725_v50  ;;  %v726_v53 = vsub.f32 %v672_v47, %v721_v52  ;;  %v1629_v54 = vpop.f32.mrb[7].mxu1 }
 0x1d1   : > { %v802_v55 = vpop.f32.mrb[0].mxu0 }
 0x1d2   : > { %810 = vst [vmem:[%s538_s10 + $0x8] sm:$0xff] %v726_v53  ;;  %1531 = vst [vmem:[%s538_s10 + $0x10] sm:$0xff] %v802_v55  ;;  %v1640_v56 = vpop.f32.mrb[1].mxu0 }
 0x1d3   : > { %v805_v57 = vpop.f32.mrb[2].mxu0 }
 0x1d4   : > { %1532 = vst [vmem:[%s538_s10 + $0x18] sm:$0xff] %v805_v57  ;;  %v1641_v58 = vpop.f32.mrb[3].mxu0 }
 0x1d5   : > { %2096 = shalt.err (!%p2093_p13)
}
 0x1d6   : > { %s2097_s23 = scalar_lea.hbm %s2769_s2, 512  ;;  %s2101_s10 = scalar_lea.hbm %s2958_s0, 2048 }
 0x1d7   : > { %p2098_p2 = scmp.ne.s32.totalorder %s2769_s2, %s2097_s23  ;;  %p2102_p1 = scmp.lt.u32.totalorder %s2769_s2, %s2958_s0 }
 0x1d8   : > { %p2103_p8 = scmp.lt.u32.totalorder %s2101_s10, %s2097_s23  ;;  %p2105_p3 = scmp.lt.u32.totalorder %s2097_s23, %s2769_s2 }
 0x1d9   : > { %p2099_p12 = pnand %p2098_p2, %p2500_p5 }
 0x1da   : > { %p2104_p0 = por %p2103_p8, %p2102_p1 }
 0x1db   : > { %p2100_p4 = pneg %p2099_p12 }
 0x1dc   : > { %p2106_p7 = por %p2105_p3, %p2104_p0 }
 0x1de   : > { %p2107_p11 = pnand %p2106_p7, %p2100_p4 }
 0x1e0   : > { %2110 = shalt.err (!%p2107_p11)
}
 0x1e1   : > { %1751 = dma.vmem_to_hbm [thread:$0]  (%p2500_p5), %s2763_s24, 512, %s2769_s2, %s2773_s25, %s2260_s3, %s2260_s3, %s2261_s15  }
 0x1e2   : > { %s545_s6 = scalar_lea.vmem [#allocation18], %s2602_s26  ;;  %s2959_s2 = sld [smem:[#allocation39_spill]] }
 0x1e3   : > { %s1211_s28 = sshll.u32 %s545_s6, 4  ;;  %s2263_s23 = smov [#allocation18]   ;;  %s2801_s28 = int_to_ptr.vmem [resolvable:$true] %s1211_s28 }
 0x1e4   : > { %s2111_s17 = scalar_lea.vmem %s2801_s28, 512  ;;  %s2115_s27 = sshll.u32 %s2263_s23, 4  ;;  %s2116_s27 = int_to_ptr.vmem [resolvable:$false] %s2115_s27 }
 0x1e5   : > { %p2112_p6 = scmp.ne.s32.totalorder %s2801_s28, %s2111_s17  ;;  %s2117_s9 = scalar_lea.vmem %s2116_s27, 1024 }
 0x1e6   : > { %p2118_p13 = scmp.lt.s32.totalorder %s2801_s28, %s2116_s27  ;;  %p2119_p2 = scmp.lt.s32.totalorder %s2117_s9, %s2111_s17 }
 0x1e7   : > { %p2113_p10 = pnand %p2112_p6, %p2500_p5 }
 0x1e8   : > { %s2807_s12 = scalar_lea.hbm %s2959_s2, %s2724_s8  ;;  %p2120_p12 = por %p2119_p2, %p2118_p13 }
 0x1e9   : > { %p2114_p9 = pneg %p2113_p10 }
 0x1eb   : > { %p2121_p4 = pnand %p2120_p12, %p2114_p9 }
 0x1f1   : > { %v937_v59 = vpop.f32.mrb[4].mxu0 }
 0x1f2   : > { %v1660_v60 = vpop.f32.mrb[5].mxu0 }
 0x1f3   : > { %v940_v61 = vpop.f32.mrb[6].mxu0 }
 0x1f4   : > { %v1661_v62 = vpop.f32.mrb[7].mxu0 }
 0x20d   : > { %v1110_v63 = vpop.f32.mrb[8].mxu1 }
 0x20e   : > { %1550 = vst [vmem:[%s545_s6 + $0x10] sm:$0xff] %v1110_v63  ;;  %v1720_v0 = vpop.f32.mrb[9].mxu1  ;;  %v1124_v7 = vmul.f32 %v1110_v63, %v1110_v63 }
 0x20f   : > { %v1113_v1 = vpop.f32.mrb[10].mxu1 }
 0x210   : > { %1551 = vst [vmem:[%s545_s6 + $0x18] sm:$0xff] %v1113_v1  ;;  %v1721_v2 = vpop.f32.mrb[11].mxu1  ;;  %v1125_v11 = vmul.f32 %v1113_v1, %v1113_v1 }
 0x211   : > { %v1026_v3 = vpop.f32.mrb[8].mxu0 }
 0x212   : > { %v1033_v4 = vsub.f32 %v937_v59, %v1026_v3  ;;  %v1680_v5 = vpop.f32.mrb[9].mxu0 }
 0x213   : > { %v1029_v6 = vpop.f32.mrb[10].mxu0 }
 0x214   : > { %1117 = vst [vmem:[%s545_s6] sm:$0xff] %v1033_v4  ;;  %v1122_v8 = vmul.f32 %v1033_v4, %v1033_v4  ;;  %v1034_v9 = vsub.f32 %v940_v61, %v1029_v6  ;;  %v1681_v10 = vpop.f32.mrb[11].mxu0 }
 0x216   : > { %v1126_v12 = vadd.f32 %v1124_v7, %v1122_v8  ;;  %1118 = vst [vmem:[%s545_s6 + $0x8] sm:$0xff] %v1034_v9  ;;  %v1123_v13 = vmul.f32 %v1034_v9, %v1034_v9 }
 0x217   : > { %2124 = shalt.err (!%p2121_p4)
}
 0x218   : > { %s2125_s8 = scalar_lea.hbm %s2807_s12, 512  ;;  %s2129_s29 = scalar_lea.hbm %s2959_s2, 2048 }
 0x219   : > { %p2126_p1 = scmp.ne.s32.totalorder %s2807_s12, %s2125_s8  ;;  %p2130_p3 = scmp.lt.u32.totalorder %s2807_s12, %s2959_s2 }
 0x21a   : > { %p2131_p7 = scmp.lt.u32.totalorder %s2129_s29, %s2125_s8  ;;  %p2133_p6 = scmp.lt.u32.totalorder %s2125_s8, %s2807_s12 }
 0x21b   : > { %p2127_p8 = pnand %p2126_p1, %p2500_p5 }
 0x21c   : > { %p2132_p11 = por %p2131_p7, %p2130_p3 }
 0x21d   : > { %p2128_p0 = pneg %p2127_p8 }
 0x21e   : > { %p2134_p10 = por %p2133_p6, %p2132_p11 }
 0x220   : > { %p2135_p9 = pnand %p2134_p10, %p2128_p0 }
 0x222   : > { %2138 = shalt.err (!%p2135_p9)
}
 0x223   : > { %1752 = dma.vmem_to_hbm [thread:$0]  (%p2500_p5), %s2801_s28, 512, %s2807_s12, %s2773_s25, %s2260_s3, %s2260_s3, %s2261_s15   ;;  %1879 = vrsqrt.f32 %v1126_v12  ;;  %v1127_v14 = vadd.f32 %v1125_v11, %v1123_v13  ;;  %vm1130_vm2 = vcmp.eq.f32.partialorder %v1126_v12, inf  ;;  %v1133_v18 = vand.u32 2147483648, %v1126_v12 }
 0x224   : > { %s1516_s24 = sshll.u32 %s2599_s7, 4  ;;  %s1573_s17 = sshll.u32 %s2956_s20, 8  ;;  %vm1132_vm3 = vcmp.eq.f32.partialorder %v1126_v12, 0.0 }
 0x225   : > { %1881 = vrsqrt.f32 %v1127_v14  ;;  %s552_s23 = scalar_lea.vmem [#allocation19], %s1516_s24  ;;  %vm1137_vm4 = vcmp.eq.f32.partialorder %v1127_v14, inf  ;;  %v1140_v22 = vand.u32 2147483648, %v1127_v14  ;;  %vm1139_vm5 = vcmp.eq.f32.partialorder %v1127_v14, 0.0  ;;  %s2960_s12 = sld [smem:[#allocation40_spill]] }
 0x226   : > { %s1229_s27 = sshll.u32 %s552_s23, 4  ;;  %s1160_s20 = scalar_lea.sflag [#allocation20], %s2599_s7  ;;  %s2841_s27 = int_to_ptr.vmem [resolvable:$true] %s1229_s27 }
 0x227   : > { %s2139_s8 = scalar_lea.vmem %s2841_s27, 256  ;;  %s2264_s10 = smov [#allocation19]  }
 0x228   : > { %p2140_p13 = scmp.ne.s32.totalorder %s2841_s27, %s2139_s8  ;;  %s2143_s14 = sshll.u32 %s2264_s10, 4  ;;  %s2144_s14 = int_to_ptr.vmem [resolvable:$false] %s2143_s14 }
 0x229   : > { %s2145_s29 = scalar_lea.vmem %s2144_s14, 512  ;;  %p2146_p4 = scmp.lt.s32.totalorder %s2841_s27, %s2144_s14 }
 0x22a   : > { %p2141_p2 = pnand %p2140_p13, %p2500_p5  ;;  %p2147_p1 = scmp.lt.s32.totalorder %s2145_s29, %s2139_s8 }
 0x22b   : > { %s2839_s9 = scalar_lea.hbm %s2960_s12, %s1573_s17 }
 0x22c   : > { %p2142_p12 = pneg %p2141_p2  ;;  %p2148_p8 = por %p2147_p1, %p2146_p4 }
 0x22d   : > { %v1880_v15 = vpop.eup %1879 }
 0x22e   : > { %v1129_v16 = vmul.f32 %v1880_v15, %v1126_v12  ;;  %p2149_p0 = pnand %p2148_p8, %p2142_p12 }
 0x22f   : > { %v1882_v17 = vpop.eup %1881 }
 0x230   : > { %v1136_v19 = vmul.f32 %v1882_v17, %v1127_v14  ;;  %v1131_v20 = vsel %vm1130_vm2, %v1126_v12, %v1129_v16 }
 0x231   : > { %v1134_v21 = vsel %vm1132_vm3, %v1133_v18, %v1131_v20 }
 0x232   : > { %v1138_v23 = vsel %vm1137_vm4, %v1127_v14, %v1136_v19  ;;  %1142 = vst [vmem:[%s552_s23] sm:$0xff] %v1134_v21 }
 0x233   : > { %v1141_v24 = vsel %vm1139_vm5, %v1140_v22, %v1138_v23 }
 0x234   : > { %1143 = vst [vmem:[%s552_s23 + $0x8] sm:$0xff] %v1141_v24 }
 0x235   : > { %2152 = shalt.err (!%p2149_p0)
}
 0x236   : > { %s2153_s6 = scalar_lea.hbm %s2839_s9, 256  ;;  %s2157_s17 = scalar_lea.hbm %s2960_s12, 1024 }
 0x237   : > { %p2154_p3 = scmp.ne.s32.totalorder %s2839_s9, %s2153_s6  ;;  %p2158_p6 = scmp.lt.u32.totalorder %s2839_s9, %s2960_s12 }
 0x238   : > { %p2159_p10 = scmp.lt.u32.totalorder %s2157_s17, %s2153_s6  ;;  %p2161_p13 = scmp.lt.u32.totalorder %s2153_s6, %s2839_s9 }
 0x239   : > { %p2155_p7 = pnand %p2154_p3, %p2500_p5 }
 0x23a   : > { %p2160_p9 = por %p2159_p10, %p2158_p6 }
 0x23b   : > { %p2156_p11 = pneg %p2155_p7 }
 0x23c   : > { %p2162_p2 = por %p2161_p13, %p2160_p9 }
 0x23e   : > { %p2163_p12 = pnand %p2162_p2, %p2156_p11 }
 0x240   : > { %2166 = shalt.err (!%p2163_p12)
}
 0x241   : > { %1753 = dma.vmem_to_hbm [thread:$0]  (%p2500_p5), %s2841_s27, 256, %s2839_s9, %s1160_s20, %s2260_s3, %s2260_s3, %s2261_s15  }
 0x242 PF: > { %s2961_s28 = sld [smem:[#allocation29_spill]]  ;;  %s2962_s8 = sld [smem:[#allocation31_spill]] }
 0x243   : > { %p1800_p4 = scmp.ge.s32.totalorder %s2245_s22, 2 }
 0x248   : > { %s1244_s10 = sand.u32 1, %s2961_s28   ;;  %p2963_p1 = scmp.ne.s32.totalorder %s2962_s8, 0 }
 0x249   : > { %s1245_s14 = scalar_lea.sflag [#allocation6], %s1244_s10 }
 0x24a   : > { %p1779_p8 = pnand %p1800_p4, %p2963_p1 }
 0x24c   : > { %2212 = dma.done.wait (!%p1779_p8), %s1245_s14, 512  }
 0x24d   : > { %2214 = vsyncadd (!%p1779_p8), %s1245_s14, 4294966784  ;;  %s2964_s30 = sadd.s32 4294967294, %s2245_s22  }
 0x24e   : > { %s1253_s29 = sand.u32 1, %s2964_s30  }
 0x24f   : > { %s1254_s6 = scalar_lea.sflag [#allocation17], %s1253_s29 }
 0x250   : > { %2216 = dma.done.wait (!%p1779_p8), %s1254_s6, 1024  }
 0x251   : > { %2218 = vsyncadd (!%p1779_p8), %s1254_s6, 4294966272  ;;  %s1272_s7 = scalar_lea.sflag [#allocation20], %s1244_s10 }
 0x252   : > { %2220 = dma.done.wait (!%p1779_p8), %s1272_s7, 256  }
 0x253   : > { %2222 = vsyncadd (!%p1779_p8), %s1272_s7, 4294967040  ;;  %s39_s22 = sadd.s32 1, %s2245_s22   ;;  %s2965_s17 = smov %s2229_s18 }
 0x254   : > { %p36_p5 = scmp.ge.s32.totalorder %s39_s22, 6   ;;  %s2966_s18 = smov %s2233_s19 }
 0x255   : > { %s2967_s19 = smov %s2511_s16  ;;  %s2968_s20 = smov %s2241_s21 }
 0x256   : > { %s2969_s21 = smov %s2971_s11  ;;  %38 = sbr.rel (!%p36_p5) target bundleno = 24 (0x18), region = 193 }
 0x25d   :  { %1277 = vsyncpa [#allocation5], 1 }
 0x25e   :  { %1279 = vsyncpa [#allocation5 + $0x1], 1 }
 0x25f   :  { %1280 = vsyncpa [#allocation8], 1 }
 0x260   :  { %1282 = vsyncpa [#allocation8 + $0x1], 1 }
 0x261   :  { %1283 = vsyncpa [#allocation11], 1 }
 0x262   :  { %1284 = vsyncpa [#allocation14], 1 }
 0x263   :  { %1285 = vsyncpa [#allocation6], 1 }
 0x264   :  { %1287 = vsyncpa [#allocation6 + $0x1], 1 }
 0x265   :  { %1288 = vsyncpa [#allocation17], 1 }
 0x266   :  { %1290 = vsyncpa [#allocation17 + $0x1], 1 }
 0x267   :  { %1291 = vsyncpa [#allocation20], 1 }
 0x268   :  { %1293 = vsyncpa [#allocation20 + $0x1], 1 }

</bundles_post_ra>
